<compile_context>
chip_gen: v7x
topology: tpu7x:2x2x1
jax: 0.10.0
libtpu: 0.0.40
codegen_flags: <defaults>
</compile_context>

<pallas_src>
import jax
import jax.numpy as jnp
from jax.experimental import pallas as pl
from jax.experimental.pallas import tpu as pltpu


def _round_up(x, m):
    return ((x + m - 1) // m) * m


# ----------------------------------------------------------------------------
# Pallas kernel: the whole decoder LSTM (all T steps) in one invocation.
# ----------------------------------------------------------------------------
def _decoder_lstm_kernel(x_ref,      # (T, Bp, Dp)    time-major lstm inputs (padded)
                         h0_ref,     # (Bp, Hp)       initial hidden (padded)
                         c0_ref,     # (Bp, Hp)       initial cell (padded)
                         wih_ref,    # (Dp, 4*Hp)     W_ih^T, gate-padded
                         whh_ref,    # (Hp, 4*Hp)     W_hh^T, gate-padded
                         b_ref,      # (1, 4*Hp)      b_ih + b_hh, gate-padded
                         fcw_ref,    # (Hp, Vp)       fc.weight^T, padded
                         fcb_ref,    # (1, Vp)        fc.bias, padded
                         out_ref,    # (T, Bp, Vp)    logits
                         xg_scr,     # (T, Bp, 4*Hp)  f32 scratch: x-projection
                         hall_scr):  # (T, Bp, Hp)    f32 scratch: h_t for all t
    T, Bp, Dp = x_ref.shape
    Hp = h0_ref.shape[-1]
    Vp = fcw_ref.shape[-1]

    # Phase 1: input projection for all timesteps at once (hoisted out of the
    # recurrence): one (T*Bp, Dp) @ (Dp, 4Hp) MXU matmul + bias.
    x2 = x_ref[...].reshape(T * Bp, Dp)
    xg = (jnp.dot(x2, wih_ref[...], preferred_element_type=jnp.float32)
          + b_ref[...])
    xg_scr[...] = xg.reshape(T, Bp, 4 * Hp)

    # Phase 2: sequential recurrence — one (Bp,Hp)@(Hp,4Hp) matmul per step.
    def step(t, carry):
        h, c = carry
        gates = xg_scr[t] + jnp.dot(h, whh_ref[...],
                                    preferred_element_type=jnp.float32)
        # PyTorch LSTMCell gate order: i, f, g, o.  Hp is a multiple of 128 so
        # every gate slice is lane-aligned (no cross-lane relayout).
        i_g = jax.nn.sigmoid(gates[:, 0 * Hp:1 * Hp])
        f_g = jax.nn.sigmoid(gates[:, 1 * Hp:2 * Hp])
        g_g = jnp.tanh(gates[:, 2 * Hp:3 * Hp])
        o_g = jax.nn.sigmoid(gates[:, 3 * Hp:4 * Hp])
        c_new = f_g * c + i_g * g_g
        h_new = o_g * jnp.tanh(c_new)
        hall_scr[t] = h_new
        return (h_new, c_new)

    h0 = h0_ref[...].astype(jnp.float32)
    c0 = c0_ref[...].astype(jnp.float32)
    jax.lax.fori_loop(0, T, step, (h0, c0), unroll=True)

    # Phase 3: output projection for all timesteps at once:
    # (T*Bp, Hp) @ (Hp, Vp) + bias; lane-dense (Vp >= 128) output write.
    h_all = hall_scr[...].reshape(T * Bp, Hp)
    logits = (jnp.dot(h_all, fcw_ref[...], preferred_element_type=jnp.float32)
              + fcb_ref[...])
    out_ref[...] = logits.reshape(T, Bp, Vp).astype(out_ref.dtype)


def decoder_lstm_pallas(lstm_inputs_tm, h0, c0, w_ih, w_hh, b_ih, b_hh,
                        fc_w, fc_b):
    """Run the sequential LSTM + fc projection inside one Pallas kernel.

    Args:
      lstm_inputs_tm: (T, B, Din) time-major per-step inputs.
      h0, c0:        (B, H) initial states.
      w_ih:          (4H, Din) PyTorch-layout LSTMCell input weights.
      w_hh:          (4H, H)   PyTorch-layout LSTMCell hidden weights.
      b_ih, b_hh:    (4H,)
      fc_w:          (V, H)    PyTorch-layout Linear weight.
      fc_b:          (V,)
    Returns:
      (T, B, V) logits, time-major, float32.
    """
    T, B, Din = lstm_inputs_tm.shape
    H = h0.shape[-1]
    V = fc_w.shape[0]

    Bp = _round_up(B, 8)       # sublane padding
    Hp = _round_up(H, 128)     # lane padding (also aligns gate slices)
    Dp = _round_up(Din, 128)
    Vp = _round_up(V, 128)     # lane-dense output

    # Zero-pad activations / states (padded rows/cols sliced away afterwards).
    x_p = jnp.pad(lstm_inputs_tm, ((0, 0), (0, Bp - B), (0, Dp - Din)))
    h0_p = jnp.pad(h0, ((0, Bp - B), (0, Hp - H)))
    c0_p = jnp.pad(c0, ((0, Bp - B), (0, Hp - H)))

    # Gate-structured zero-padding of the LSTMCell weights: each gate ends up
    # occupying a full Hp-wide (128-aligned) block of the 4*Hp gate axis.
    def pad_gates(w, in_dim, in_dim_p):
        w4 = w.reshape(4, H, in_dim)
        w4 = jnp.pad(w4, ((0, 0), (0, Hp - H), (0, in_dim_p - in_dim)))
        return w4.reshape(4 * Hp, in_dim_p)

    wih_t = jnp.transpose(pad_gates(w_ih, Din, Dp))          # (Dp, 4Hp)
    whh_t = jnp.transpose(pad_gates(w_hh, H, Hp))            # (Hp, 4Hp)
    b = jnp.pad((b_ih + b_hh).reshape(4, H),
                ((0, 0), (0, Hp - H))).reshape(1, 4 * Hp)    # (1, 4Hp)

    fcw_t = jnp.transpose(jnp.pad(fc_w, ((0, Vp - V), (0, Hp - H))))  # (Hp, Vp)
    fcb = jnp.pad(fc_b, (0, Vp - V)).reshape(1, Vp)                   # (1, Vp)

    vmem = pl.BlockSpec(memory_space=pltpu.MemorySpace.VMEM)
    out_p = pl.pallas_call(
        _decoder_lstm_kernel,
        out_shape=jax.ShapeDtypeStruct((T, Bp, Vp), jnp.float32),
        in_specs=[vmem] * 8,
        out_specs=vmem,
        scratch_shapes=[
            pltpu.VMEM((T, Bp, 4 * Hp), jnp.float32),   # hoisted x-projection
            pltpu.VMEM((T, Bp, Hp), jnp.float32),       # h_t for all steps
        ],
    )(x_p, h0_p, c0_p, wih_t, whh_t, b, fcw_t, fcb)

    return out_p[:, :B, :V]                              # (T, B, V)


# ----------------------------------------------------------------------------
# Full DecoderRNN.forward (glue in JAX + hot path in Pallas).
# ----------------------------------------------------------------------------
def decoder_rnn_forward(params, global_features, object_features, captions):
    """Matches DecoderRNN.forward (dropout treated as eval-mode identity)."""
    # TODO(synk): nn.Dropout(0.5) in training mode is stochastic; implemented
    # as identity (eval mode) here.
    features = global_features @ params["fp_w"].T + params["fp_b"]      # (B, E)
    obj_mean = jnp.mean(object_features, axis=1)                        # (B, E)
    combined = jnp.concatenate([features, obj_mean], axis=1)            # (B, 2E)

    emb = params["embedding"][captions[:, :-1]]                         # (B, T, E)

    h0 = combined @ params["ih_w"].T + params["ih_b"]                   # (B, H)
    c0 = combined @ params["ic_w"].T + params["ic_b"]                   # (B, H)

    T = emb.shape[1]
    combined_exp = jnp.broadcast_to(combined[:, None, :],
                                    (combined.shape[0], T, combined.shape[1]))
    lstm_inputs = jnp.concatenate([emb, combined_exp], axis=2)          # (B, T, 3E)
    lstm_inputs_tm = jnp.transpose(lstm_inputs, (1, 0, 2))              # (T, B, 3E)

    out_tm = decoder_lstm_pallas(
        lstm_inputs_tm, h0, c0,
        params["lstm_w_ih"], params["lstm_w_hh"],
        params["lstm_b_ih"], params["lstm_b_hh"],
        params["fc_w"], params["fc_b"])                                  # (T, B, V)

    return jnp.transpose(out_tm, (1, 0, 2))                             # (B, T, V)


# Pure-JAX reference (lax.scan) used for a correctness check.
def decoder_rnn_reference(params, global_features, object_features, captions):
    features = global_features @ params["fp_w"].T + params["fp_b"]
    obj_mean = jnp.mean(object_features, axis=1)
    combined = jnp.concatenate([features, obj_mean], axis=1)
    emb = params["embedding"][captions[:, :-1]]
    h0 = combined @ params["ih_w"].T + params["ih_b"]
    c0 = combined @ params["ic_w"].T + params["ic_b"]
    T = emb.shape[1]
    combined_exp = jnp.broadcast_to(combined[:, None, :],
                                    (combined.shape[0], T, combined.shape[1]))
    lstm_inputs = jnp.concatenate([emb, combined_exp], axis=2)
    H = h0.shape[-1]

    def step(carry, x_t):
        h, c = carry
        gates = (x_t @ params["lstm_w_ih"].T + params["lstm_b_ih"]
                 + h @ params["lstm_w_hh"].T + params["lstm_b_hh"])
        i = jax.nn.sigmoid(gates[:, 0 * H:1 * H])
        f = jax.nn.sigmoid(gates[:, 1 * H:2 * H])
        g = jnp.tanh(gates[:, 2 * H:3 * H])
        o = jax.nn.sigmoid(gates[:, 3 * H:4 * H])
        c_new = f * c + i * g
        h_new = o * jnp.tanh(c_new)
        logits = h_new @ params["fc_w"].T + params["fc_b"]
        return (h_new, c_new), logits

    _, outs = jax.lax.scan(step, (h0, c0), jnp.transpose(lstm_inputs, (1, 0, 2)))
    return jnp.transpose(outs, (1, 0, 2))


# ----------------------------------------------------------------------------
# Deterministic parameter init (mirrors shapes of DecoderRNN.__init__).
# ----------------------------------------------------------------------------
def init_params(key, input_size, embed_size, hidden_size, vocab_size):
    ks = jax.random.split(key, 10)
    E, H, V = embed_size, hidden_size, vocab_size

    def xavier(k, shape):
        fan_out, fan_in = shape
        bound = jnp.sqrt(6.0 / (fan_in + fan_out))
        return jax.random.uniform(k, shape, jnp.float32, -bound, bound)

    lstm_in = E + 2 * E
    lstm_bound = 1.0 / jnp.sqrt(jnp.float32(H))
    return {
        "embedding": jax.random.uniform(ks[0], (V, E), jnp.float32, -0.1, 0.1),
        "fp_w": xavier(ks[1], (E, input_size)),
        "fp_b": jnp.zeros((E,), jnp.float32),
        "ih_w": xavier(ks[2], (H, 2 * E)),
        "ih_b": jnp.zeros((H,), jnp.float32),
        "ic_w": xavier(ks[3], (H, 2 * E)),
        "ic_b": jnp.zeros((H,), jnp.float32),
        "lstm_w_ih": jax.random.uniform(ks[4], (4 * H, lstm_in), jnp.float32,
                                        -lstm_bound, lstm_bound),
        "lstm_w_hh": jax.random.uniform(ks[5], (4 * H, H), jnp.float32,
                                        -lstm_bound, lstm_bound),
        "lstm_b_ih": jax.random.uniform(ks[6], (4 * H,), jnp.float32,
                                        -lstm_bound, lstm_bound),
        "lstm_b_hh": jax.random.uniform(ks[7], (4 * H,), jnp.float32,
                                        -lstm_bound, lstm_bound),
        "fc_w": jax.random.uniform(ks[8], (V, H), jnp.float32, -0.1, 0.1),
        "fc_b": jnp.zeros((V,), jnp.float32),
    }


if __name__ == "__main__":
    # Small shapes consistent with the module's forward.
    batch = 2
    input_size = 48
    embed_size = 32
    hidden_size = 32
    vocab_size = 64
    max_objects = 5
    max_seq_len = 9          # -> T = 8 LSTM steps

    key = jax.random.PRNGKey(0)
    k_p, k_g, k_o, k_c = jax.random.split(key, 4)

    params = init_params(k_p, input_size, embed_size, hidden_size, vocab_size)
    global_features = jax.random.normal(k_g, (batch, input_size), jnp.float32)
    object_features = jax.random.normal(
        k_o, (batch, max_objects, embed_size), jnp.float32)
    captions = jax.random.randint(
        k_c, (batch, max_seq_len), 0, vocab_size, jnp.int32)

    out = jax.jit(decoder_rnn_forward)(
        params, global_features, object_features, captions)
    out = jax.block_until_ready(out)

    ref = decoder_rnn_reference(params, global_features, object_features,
                                captions)
    assert out.shape == (batch, max_seq_len - 1, vocab_size), out.shape
    assert jnp.allclose(out, ref, atol=1e-4, rtol=1e-4), \
        float(jnp.max(jnp.abs(out - ref)))

    print("KERNEL_OK")
</pallas_src>

<mosaic_0001>
module attributes {stable_mosaic.version = 11 : i64} {
  func.func @_decoder_lstm_kernel(%arg0: memref<8x8x128xf32, #tpu.memory_space<vmem>>, %arg1: memref<8x128xf32, #tpu.memory_space<vmem>>, %arg2: memref<8x128xf32, #tpu.memory_space<vmem>>, %arg3: memref<128x512xf32, #tpu.memory_space<vmem>>, %arg4: memref<128x512xf32, #tpu.memory_space<vmem>>, %arg5: memref<1x512xf32, #tpu.memory_space<vmem>>, %arg6: memref<128x128xf32, #tpu.memory_space<vmem>>, %arg7: memref<1x128xf32, #tpu.memory_space<vmem>>, %arg8: memref<8x8x128xf32, #tpu.memory_space<vmem>>, %arg9: memref<8x8x512xf32, #tpu.memory_space<vmem>>, %arg10: memref<8x8x128xf32, #tpu.memory_space<vmem>>) attributes {dimension_semantics = [], scalar_prefetch = 0 : i64, scratch_operands = 2 : i64, tpu.core_type = #tpu.core_type<tc>} {
    %c0 = arith.constant 0 : index
    %c0_0 = arith.constant 0 : index
    %c0_1 = arith.constant 0 : index
    %0 = vector.load %arg0[%c0, %c0_0, %c0_1] : memref<8x8x128xf32, #tpu.memory_space<vmem>>, vector<8x8x128xf32>
    %1 = vector.shape_cast %0 : vector<8x8x128xf32> to vector<64x128xf32>
    %c0_2 = arith.constant 0 : index
    %c0_3 = arith.constant 0 : index
    %2 = vector.load %arg3[%c0_2, %c0_3] : memref<128x512xf32, #tpu.memory_space<vmem>>, vector<128x512xf32>
    %cst = arith.constant dense<0.000000e+00> : vector<64x512xf32>
    %3 = tpu.matmul %1, %2, %cst {dimension_numbers = #tpu.dot_dimension_numbers<[1], [0], [0], [1], [0, 0, 1, 1], [], []>} : vector<64x128xf32>, vector<128x512xf32>, vector<64x512xf32> -> vector<64x512xf32>
    %c0_4 = arith.constant 0 : index
    %c0_5 = arith.constant 0 : index
    %4 = vector.load %arg5[%c0_4, %c0_5] : memref<1x512xf32, #tpu.memory_space<vmem>>, vector<1x512xf32>
    %5 = vector.broadcast %4 : vector<1x512xf32> to vector<64x512xf32>
    %6 = arith.addf %3, %5 : vector<64x512xf32>
    %7 = vector.shape_cast %6 : vector<64x512xf32> to vector<8x8x512xf32>
    %c0_6 = arith.constant 0 : index
    %c0_7 = arith.constant 0 : index
    %c0_8 = arith.constant 0 : index
    %8 = vector.load %arg9[%c0_6, %c0_7, %c0_8] : memref<8x8x512xf32, #tpu.memory_space<vmem>>, vector<8x8x512xf32>
    tpu.vector_store %arg9[%c0_6, %c0_7, %c0_8], %7 {strides = array<i32>} : memref<8x8x512xf32, #tpu.memory_space<vmem>>, vector<8x8x512xf32>,
    %c0_9 = arith.constant 0 : index
    %c0_10 = arith.constant 0 : index
    %9 = vector.load %arg1[%c0_9, %c0_10] : memref<8x128xf32, #tpu.memory_space<vmem>>, vector<8x128xf32>
    %c0_11 = arith.constant 0 : index
    %c0_12 = arith.constant 0 : index
    %10 = vector.load %arg2[%c0_11, %c0_12] : memref<8x128xf32, #tpu.memory_space<vmem>>, vector<8x128xf32>
    %c0_i32 = arith.constant 0 : i32
    %11 = arith.index_cast %c0_i32 : i32 to index
    %c0_13 = arith.constant 0 : index
    %c0_14 = arith.constant 0 : index
    %12 = vector.load %arg9[%11, %c0_13, %c0_14] : memref<8x8x512xf32, #tpu.memory_space<vmem>>, vector<1x8x512xf32>
    %13 = vector.shape_cast %12 : vector<1x8x512xf32> to vector<8x512xf32>
    %c0_15 = arith.constant 0 : index
    %c0_16 = arith.constant 0 : index
    %14 = vector.load %arg4[%c0_15, %c0_16] : memref<128x512xf32, #tpu.memory_space<vmem>>, vector<128x512xf32>
    %cst_17 = arith.constant dense<0.000000e+00> : vector<8x512xf32>
    %15 = tpu.matmul %9, %14, %cst_17 {dimension_numbers = #tpu.dot_dimension_numbers<[1], [0], [0], [1], [0, 0, 1, 1], [], []>} : vector<8x128xf32>, vector<128x512xf32>, vector<8x512xf32> -> vector<8x512xf32>
    %16 = arith.addf %13, %15 : vector<8x512xf32>
    %17 = vector.extract_strided_slice %16 {offsets = [0, 0], sizes = [8, 128], strides = [1, 1]} : vector<8x512xf32> to vector<8x128xf32>
    %18 = arith.negf %17 : vector<8x128xf32>
    %19 = math.exp %18 : vector<8x128xf32>
    %cst_18 = arith.constant 1.000000e+00 : f32
    %20 = vector.broadcast %cst_18 : f32 to vector<8x128xf32>
    %21 = arith.addf %20, %19 : vector<8x128xf32>
    %22 = arith.divf %20, %21 : vector<8x128xf32>
    %23 = vector.extract_strided_slice %16 {offsets = [0, 128], sizes = [8, 128], strides = [1, 1]} : vector<8x512xf32> to vector<8x128xf32>
    %24 = arith.negf %23 : vector<8x128xf32>
    %25 = math.exp %24 : vector<8x128xf32>
    %cst_19 = arith.constant 1.000000e+00 : f32
    %26 = vector.broadcast %cst_19 : f32 to vector<8x128xf32>
    %27 = arith.addf %26, %25 : vector<8x128xf32>
    %28 = arith.divf %26, %27 : vector<8x128xf32>
    %29 = vector.extract_strided_slice %16 {offsets = [0, 256], sizes = [8, 128], strides = [1, 1]} : vector<8x512xf32> to vector<8x128xf32>
    %30 = math.tanh %29 : vector<8x128xf32>
    %31 = vector.extract_strided_slice %16 {offsets = [0, 384], sizes = [8, 128], strides = [1, 1]} : vector<8x512xf32> to vector<8x128xf32>
    %32 = arith.negf %31 : vector<8x128xf32>
    %33 = math.exp %32 : vector<8x128xf32>
    %cst_20 = arith.constant 1.000000e+00 : f32
    %34 = vector.broadcast %cst_20 : f32 to vector<8x128xf32>
    %35 = arith.addf %34, %33 : vector<8x128xf32>
    %36 = arith.divf %34, %35 : vector<8x128xf32>
    %37 = arith.mulf %28, %10 : vector<8x128xf32>
    %38 = arith.mulf %22, %30 : vector<8x128xf32>
    %39 = arith.addf %37, %38 : vector<8x128xf32>
    %40 = math.tanh %39 : vector<8x128xf32>
    %41 = arith.mulf %36, %40 : vector<8x128xf32>
    %42 = arith.index_cast %c0_i32 : i32 to index
    %c0_21 = arith.constant 0 : index
    %c0_22 = arith.constant 0 : index
    %43 = vector.load %arg10[%42, %c0_21, %c0_22] : memref<8x8x128xf32, #tpu.memory_space<vmem>>, vector<1x8x128xf32>
    %44 = vector.shape_cast %43 : vector<1x8x128xf32> to vector<8x128xf32>
    %45 = vector.shape_cast %41 : vector<8x128xf32> to vector<1x8x128xf32>
    tpu.vector_store %arg10[%42, %c0_21, %c0_22], %45 {strides = array<i32>} : memref<8x8x128xf32, #tpu.memory_space<vmem>>, vector<1x8x128xf32>,
    %c1_i32 = arith.constant 1 : i32
    %46 = arith.index_cast %c1_i32 : i32 to index
    %c0_23 = arith.constant 0 : index
    %c0_24 = arith.constant 0 : index
    %47 = vector.load %arg9[%46, %c0_23, %c0_24] : memref<8x8x512xf32, #tpu.memory_space<vmem>>, vector<1x8x512xf32>
    %48 = vector.shape_cast %47 : vector<1x8x512xf32> to vector<8x512xf32>
    %c0_25 = arith.constant 0 : index
    %c0_26 = arith.constant 0 : index
    %49 = vector.load %arg4[%c0_25, %c0_26] : memref<128x512xf32, #tpu.memory_space<vmem>>, vector<128x512xf32>
    %cst_27 = arith.constant dense<0.000000e+00> : vector<8x512xf32>
    %50 = tpu.matmul %41, %49, %cst_27 {dimension_numbers = #tpu.dot_dimension_numbers<[1], [0], [0], [1], [0, 0, 1, 1], [], []>} : vector<8x128xf32>, vector<128x512xf32>, vector<8x512xf32> -> vector<8x512xf32>
    %51 = arith.addf %48, %50 : vector<8x512xf32>
    %52 = vector.extract_strided_slice %51 {offsets = [0, 0], sizes = [8, 128], strides = [1, 1]} : vector<8x512xf32> to vector<8x128xf32>
    %53 = arith.negf %52 : vector<8x128xf32>
    %54 = math.exp %53 : vector<8x128xf32>
    %cst_28 = arith.constant 1.000000e+00 : f32
    %55 = vector.broadcast %cst_28 : f32 to vector<8x128xf32>
    %56 = arith.addf %55, %54 : vector<8x128xf32>
    %57 = arith.divf %55, %56 : vector<8x128xf32>
    %58 = vector.extract_strided_slice %51 {offsets = [0, 128], sizes = [8, 128], strides = [1, 1]} : vector<8x512xf32> to vector<8x128xf32>
    %59 = arith.negf %58 : vector<8x128xf32>
    %60 = math.exp %59 : vector<8x128xf32>
    %cst_29 = arith.constant 1.000000e+00 : f32
    %61 = vector.broadcast %cst_29 : f32 to vector<8x128xf32>
    %62 = arith.addf %61, %60 : vector<8x128xf32>
    %63 = arith.divf %61, %62 : vector<8x128xf32>
    %64 = vector.extract_strided_slice %51 {offsets = [0, 256], sizes = [8, 128], strides = [1, 1]} : vector<8x512xf32> to vector<8x128xf32>
    %65 = math.tanh %64 : vector<8x128xf32>
    %66 = vector.extract_strided_slice %51 {offsets = [0, 384], sizes = [8, 128], strides = [1, 1]} : vector<8x512xf32> to vector<8x128xf32>
    %67 = arith.negf %66 : vector<8x128xf32>
    %68 = math.exp %67 : vector<8x128xf32>
    %cst_30 = arith.constant 1.000000e+00 : f32
    %69 = vector.broadcast %cst_30 : f32 to vector<8x128xf32>
    %70 = arith.addf %69, %68 : vector<8x128xf32>
    %71 = arith.divf %69, %70 : vector<8x128xf32>
    %72 = arith.mulf %63, %39 : vector<8x128xf32>
    %73 = arith.mulf %57, %65 : vector<8x128xf32>
    %74 = arith.addf %72, %73 : vector<8x128xf32>
    %75 = math.tanh %74 : vector<8x128xf32>
    %76 = arith.mulf %71, %75 : vector<8x128xf32>
    %77 = arith.index_cast %c1_i32 : i32 to index
    %c0_31 = arith.constant 0 : index
    %c0_32 = arith.constant 0 : index
    %78 = vector.load %arg10[%77, %c0_31, %c0_32] : memref<8x8x128xf32, #tpu.memory_space<vmem>>, vector<1x8x128xf32>
    %79 = vector.shape_cast %78 : vector<1x8x128xf32> to vector<8x128xf32>
    %80 = vector.shape_cast %76 : vector<8x128xf32> to vector<1x8x128xf32>
    tpu.vector_store %arg10[%77, %c0_31, %c0_32], %80 {strides = array<i32>} : memref<8x8x128xf32, #tpu.memory_space<vmem>>, vector<1x8x128xf32>,
    %c2_i32 = arith.constant 2 : i32
    %81 = arith.index_cast %c2_i32 : i32 to index
    %c0_33 = arith.constant 0 : index
    %c0_34 = arith.constant 0 : index
    %82 = vector.load %arg9[%81, %c0_33, %c0_34] : memref<8x8x512xf32, #tpu.memory_space<vmem>>, vector<1x8x512xf32>
    %83 = vector.shape_cast %82 : vector<1x8x512xf32> to vector<8x512xf32>
    %c0_35 = arith.constant 0 : index
    %c0_36 = arith.constant 0 : index
    %84 = vector.load %arg4[%c0_35, %c0_36] : memref<128x512xf32, #tpu.memory_space<vmem>>, vector<128x512xf32>
    %cst_37 = arith.constant dense<0.000000e+00> : vector<8x512xf32>
    %85 = tpu.matmul %76, %84, %cst_37 {dimension_numbers = #tpu.dot_dimension_numbers<[1], [0], [0], [1], [0, 0, 1, 1], [], []>} : vector<8x128xf32>, vector<128x512xf32>, vector<8x512xf32> -> vector<8x512xf32>
    %86 = arith.addf %83, %85 : vector<8x512xf32>
    %87 = vector.extract_strided_slice %86 {offsets = [0, 0], sizes = [8, 128], strides = [1, 1]} : vector<8x512xf32> to vector<8x128xf32>
    %88 = arith.negf %87 : vector<8x128xf32>
    %89 = math.exp %88 : vector<8x128xf32>
    %cst_38 = arith.constant 1.000000e+00 : f32
    %90 = vector.broadcast %cst_38 : f32 to vector<8x128xf32>
    %91 = arith.addf %90, %89 : vector<8x128xf32>
    %92 = arith.divf %90, %91 : vector<8x128xf32>
    %93 = vector.extract_strided_slice %86 {offsets = [0, 128], sizes = [8, 128], strides = [1, 1]} : vector<8x512xf32> to vector<8x128xf32>
    %94 = arith.negf %93 : vector<8x128xf32>
    %95 = math.exp %94 : vector<8x128xf32>
    %cst_39 = arith.constant 1.000000e+00 : f32
    %96 = vector.broadcast %cst_39 : f32 to vector<8x128xf32>
    %97 = arith.addf %96, %95 : vector<8x128xf32>
    %98 = arith.divf %96, %97 : vector<8x128xf32>
    %99 = vector.extract_strided_slice %86 {offsets = [0, 256], sizes = [8, 128], strides = [1, 1]} : vector<8x512xf32> to vector<8x128xf32>
    %100 = math.tanh %99 : vector<8x128xf32>
    %101 = vector.extract_strided_slice %86 {offsets = [0, 384], sizes = [8, 128], strides = [1, 1]} : vector<8x512xf32> to vector<8x128xf32>
    %102 = arith.negf %101 : vector<8x128xf32>
    %103 = math.exp %102 : vector<8x128xf32>
    %cst_40 = arith.constant 1.000000e+00 : f32
    %104 = vector.broadcast %cst_40 : f32 to vector<8x128xf32>
    %105 = arith.addf %104, %103 : vector<8x128xf32>
    %106 = arith.divf %104, %105 : vector<8x128xf32>
    %107 = arith.mulf %98, %74 : vector<8x128xf32>
    %108 = arith.mulf %92, %100 : vector<8x128xf32>
    %109 = arith.addf %107, %108 : vector<8x128xf32>
    %110 = math.tanh %109 : vector<8x128xf32>
    %111 = arith.mulf %106, %110 : vector<8x128xf32>
    %112 = arith.index_cast %c2_i32 : i32 to index
    %c0_41 = arith.constant 0 : index
    %c0_42 = arith.constant 0 : index
    %113 = vector.load %arg10[%112, %c0_41, %c0_42] : memref<8x8x128xf32, #tpu.memory_space<vmem>>, vector<1x8x128xf32>
    %114 = vector.shape_cast %113 : vector<1x8x128xf32> to vector<8x128xf32>
    %115 = vector.shape_cast %111 : vector<8x128xf32> to vector<1x8x128xf32>
    tpu.vector_store %arg10[%112, %c0_41, %c0_42], %115 {strides = array<i32>} : memref<8x8x128xf32, #tpu.memory_space<vmem>>, vector<1x8x128xf32>,
    %c3_i32 = arith.constant 3 : i32
    %116 = arith.index_cast %c3_i32 : i32 to index
    %c0_43 = arith.constant 0 : index
    %c0_44 = arith.constant 0 : index
    %117 = vector.load %arg9[%116, %c0_43, %c0_44] : memref<8x8x512xf32, #tpu.memory_space<vmem>>, vector<1x8x512xf32>
    %118 = vector.shape_cast %117 : vector<1x8x512xf32> to vector<8x512xf32>
    %c0_45 = arith.constant 0 : index
    %c0_46 = arith.constant 0 : index
    %119 = vector.load %arg4[%c0_45, %c0_46] : memref<128x512xf32, #tpu.memory_space<vmem>>, vector<128x512xf32>
    %cst_47 = arith.constant dense<0.000000e+00> : vector<8x512xf32>
    %120 = tpu.matmul %111, %119, %cst_47 {dimension_numbers = #tpu.dot_dimension_numbers<[1], [0], [0], [1], [0, 0, 1, 1], [], []>} : vector<8x128xf32>, vector<128x512xf32>, vector<8x512xf32> -> vector<8x512xf32>
    %121 = arith.addf %118, %120 : vector<8x512xf32>
    %122 = vector.extract_strided_slice %121 {offsets = [0, 0], sizes = [8, 128], strides = [1, 1]} : vector<8x512xf32> to vector<8x128xf32>
    %123 = arith.negf %122 : vector<8x128xf32>
    %124 = math.exp %123 : vector<8x128xf32>
    %cst_48 = arith.constant 1.000000e+00 : f32
    %125 = vector.broadcast %cst_48 : f32 to vector<8x128xf32>
    %126 = arith.addf %125, %124 : vector<8x128xf32>
    %127 = arith.divf %125, %126 : vector<8x128xf32>
    %128 = vector.extract_strided_slice %121 {offsets = [0, 128], sizes = [8, 128], strides = [1, 1]} : vector<8x512xf32> to vector<8x128xf32>
    %129 = arith.negf %128 : vector<8x128xf32>
    %130 = math.exp %129 : vector<8x128xf32>
    %cst_49 = arith.constant 1.000000e+00 : f32
    %131 = vector.broadcast %cst_49 : f32 to vector<8x128xf32>
    %132 = arith.addf %131, %130 : vector<8x128xf32>
    %133 = arith.divf %131, %132 : vector<8x128xf32>
    %134 = vector.extract_strided_slice %121 {offsets = [0, 256], sizes = [8, 128], strides = [1, 1]} : vector<8x512xf32> to vector<8x128xf32>
    %135 = math.tanh %134 : vector<8x128xf32>
    %136 = vector.extract_strided_slice %121 {offsets = [0, 384], sizes = [8, 128], strides = [1, 1]} : vector<8x512xf32> to vector<8x128xf32>
    %137 = arith.negf %136 : vector<8x128xf32>
    %138 = math.exp %137 : vector<8x128xf32>
    %cst_50 = arith.constant 1.000000e+00 : f32
    %139 = vector.broadcast %cst_50 : f32 to vector<8x128xf32>
    %140 = arith.addf %139, %138 : vector<8x128xf32>
    %141 = arith.divf %139, %140 : vector<8x128xf32>
    %142 = arith.mulf %133, %109 : vector<8x128xf32>
    %143 = arith.mulf %127, %135 : vector<8x128xf32>
    %144 = arith.addf %142, %143 : vector<8x128xf32>
    %145 = math.tanh %144 : vector<8x128xf32>
    %146 = arith.mulf %141, %145 : vector<8x128xf32>
    %147 = arith.index_cast %c3_i32 : i32 to index
    %c0_51 = arith.constant 0 : index
    %c0_52 = arith.constant 0 : index
    %148 = vector.load %arg10[%147, %c0_51, %c0_52] : memref<8x8x128xf32, #tpu.memory_space<vmem>>, vector<1x8x128xf32>
    %149 = vector.shape_cast %148 : vector<1x8x128xf32> to vector<8x128xf32>
    %150 = vector.shape_cast %146 : vector<8x128xf32> to vector<1x8x128xf32>
    tpu.vector_store %arg10[%147, %c0_51, %c0_52], %150 {strides = array<i32>} : memref<8x8x128xf32, #tpu.memory_space<vmem>>, vector<1x8x128xf32>,
    %c4_i32 = arith.constant 4 : i32
    %151 = arith.index_cast %c4_i32 : i32 to index
    %c0_53 = arith.constant 0 : index
    %c0_54 = arith.constant 0 : index
    %152 = vector.load %arg9[%151, %c0_53, %c0_54] : memref<8x8x512xf32, #tpu.memory_space<vmem>>, vector<1x8x512xf32>
    %153 = vector.shape_cast %152 : vector<1x8x512xf32> to vector<8x512xf32>
    %c0_55 = arith.constant 0 : index
    %c0_56 = arith.constant 0 : index
    %154 = vector.load %arg4[%c0_55, %c0_56] : memref<128x512xf32, #tpu.memory_space<vmem>>, vector<128x512xf32>
    %cst_57 = arith.constant dense<0.000000e+00> : vector<8x512xf32>
    %155 = tpu.matmul %146, %154, %cst_57 {dimension_numbers = #tpu.dot_dimension_numbers<[1], [0], [0], [1], [0, 0, 1, 1], [], []>} : vector<8x128xf32>, vector<128x512xf32>, vector<8x512xf32> -> vector<8x512xf32>
    %156 = arith.addf %153, %155 : vector<8x512xf32>
    %157 = vector.extract_strided_slice %156 {offsets = [0, 0], sizes = [8, 128], strides = [1, 1]} : vector<8x512xf32> to vector<8x128xf32>
    %158 = arith.negf %157 : vector<8x128xf32>
    %159 = math.exp %158 : vector<8x128xf32>
    %cst_58 = arith.constant 1.000000e+00 : f32
    %160 = vector.broadcast %cst_58 : f32 to vector<8x128xf32>
    %161 = arith.addf %160, %159 : vector<8x128xf32>
    %162 = arith.divf %160, %161 : vector<8x128xf32>
    %163 = vector.extract_strided_slice %156 {offsets = [0, 128], sizes = [8, 128], strides = [1, 1]} : vector<8x512xf32> to vector<8x128xf32>
    %164 = arith.negf %163 : vector<8x128xf32>
    %165 = math.exp %164 : vector<8x128xf32>
    %cst_59 = arith.constant 1.000000e+00 : f32
    %166 = vector.broadcast %cst_59 : f32 to vector<8x128xf32>
    %167 = arith.addf %166, %165 : vector<8x128xf32>
    %168 = arith.divf %166, %167 : vector<8x128xf32>
    %169 = vector.extract_strided_slice %156 {offsets = [0, 256], sizes = [8, 128], strides = [1, 1]} : vector<8x512xf32> to vector<8x128xf32>
    %170 = math.tanh %169 : vector<8x128xf32>
    %171 = vector.extract_strided_slice %156 {offsets = [0, 384], sizes = [8, 128], strides = [1, 1]} : vector<8x512xf32> to vector<8x128xf32>
    %172 = arith.negf %171 : vector<8x128xf32>
    %173 = math.exp %172 : vector<8x128xf32>
    %cst_60 = arith.constant 1.000000e+00 : f32
    %174 = vector.broadcast %cst_60 : f32 to vector<8x128xf32>
    %175 = arith.addf %174, %173 : vector<8x128xf32>
    %176 = arith.divf %174, %175 : vector<8x128xf32>
    %177 = arith.mulf %168, %144 : vector<8x128xf32>
    %178 = arith.mulf %162, %170 : vector<8x128xf32>
    %179 = arith.addf %177, %178 : vector<8x128xf32>
    %180 = math.tanh %179 : vector<8x128xf32>
    %181 = arith.mulf %176, %180 : vector<8x128xf32>
    %182 = arith.index_cast %c4_i32 : i32 to index
    %c0_61 = arith.constant 0 : index
    %c0_62 = arith.constant 0 : index
    %183 = vector.load %arg10[%182, %c0_61, %c0_62] : memref<8x8x128xf32, #tpu.memory_space<vmem>>, vector<1x8x128xf32>
    %184 = vector.shape_cast %183 : vector<1x8x128xf32> to vector<8x128xf32>
    %185 = vector.shape_cast %181 : vector<8x128xf32> to vector<1x8x128xf32>
    tpu.vector_store %arg10[%182, %c0_61, %c0_62], %185 {strides = array<i32>} : memref<8x8x128xf32, #tpu.memory_space<vmem>>, vector<1x8x128xf32>,
    %c5_i32 = arith.constant 5 : i32
    %186 = arith.index_cast %c5_i32 : i32 to index
    %c0_63 = arith.constant 0 : index
    %c0_64 = arith.constant 0 : index
    %187 = vector.load %arg9[%186, %c0_63, %c0_64] : memref<8x8x512xf32, #tpu.memory_space<vmem>>, vector<1x8x512xf32>
    %188 = vector.shape_cast %187 : vector<1x8x512xf32> to vector<8x512xf32>
    %c0_65 = arith.constant 0 : index
    %c0_66 = arith.constant 0 : index
    %189 = vector.load %arg4[%c0_65, %c0_66] : memref<128x512xf32, #tpu.memory_space<vmem>>, vector<128x512xf32>
    %cst_67 = arith.constant dense<0.000000e+00> : vector<8x512xf32>
    %190 = tpu.matmul %181, %189, %cst_67 {dimension_numbers = #tpu.dot_dimension_numbers<[1], [0], [0], [1], [0, 0, 1, 1], [], []>} : vector<8x128xf32>, vector<128x512xf32>, vector<8x512xf32> -> vector<8x512xf32>
    %191 = arith.addf %188, %190 : vector<8x512xf32>
    %192 = vector.extract_strided_slice %191 {offsets = [0, 0], sizes = [8, 128], strides = [1, 1]} : vector<8x512xf32> to vector<8x128xf32>
    %193 = arith.negf %192 : vector<8x128xf32>
    %194 = math.exp %193 : vector<8x128xf32>
    %cst_68 = arith.constant 1.000000e+00 : f32
    %195 = vector.broadcast %cst_68 : f32 to vector<8x128xf32>
    %196 = arith.addf %195, %194 : vector<8x128xf32>
    %197 = arith.divf %195, %196 : vector<8x128xf32>
    %198 = vector.extract_strided_slice %191 {offsets = [0, 128], sizes = [8, 128], strides = [1, 1]} : vector<8x512xf32> to vector<8x128xf32>
    %199 = arith.negf %198 : vector<8x128xf32>
    %200 = math.exp %199 : vector<8x128xf32>
    %cst_69 = arith.constant 1.000000e+00 : f32
    %201 = vector.broadcast %cst_69 : f32 to vector<8x128xf32>
    %202 = arith.addf %201, %200 : vector<8x128xf32>
    %203 = arith.divf %201, %202 : vector<8x128xf32>
    %204 = vector.extract_strided_slice %191 {offsets = [0, 256], sizes = [8, 128], strides = [1, 1]} : vector<8x512xf32> to vector<8x128xf32>
    %205 = math.tanh %204 : vector<8x128xf32>
    %206 = vector.extract_strided_slice %191 {offsets = [0, 384], sizes = [8, 128], strides = [1, 1]} : vector<8x512xf32> to vector<8x128xf32>
    %207 = arith.negf %206 : vector<8x128xf32>
    %208 = math.exp %207 : vector<8x128xf32>
    %cst_70 = arith.constant 1.000000e+00 : f32
    %209 = vector.broadcast %cst_70 : f32 to vector<8x128xf32>
    %210 = arith.addf %209, %208 : vector<8x128xf32>
    %211 = arith.divf %209, %210 : vector<8x128xf32>
    %212 = arith.mulf %203, %179 : vector<8x128xf32>
    %213 = arith.mulf %197, %205 : vector<8x128xf32>
    %214 = arith.addf %212, %213 : vector<8x128xf32>
    %215 = math.tanh %214 : vector<8x128xf32>
    %216 = arith.mulf %211, %215 : vector<8x128xf32>
    %217 = arith.index_cast %c5_i32 : i32 to index
    %c0_71 = arith.constant 0 : index
    %c0_72 = arith.constant 0 : index
    %218 = vector.load %arg10[%217, %c0_71, %c0_72] : memref<8x8x128xf32, #tpu.memory_space<vmem>>, vector<1x8x128xf32>
    %219 = vector.shape_cast %218 : vector<1x8x128xf32> to vector<8x128xf32>
    %220 = vector.shape_cast %216 : vector<8x128xf32> to vector<1x8x128xf32>
    tpu.vector_store %arg10[%217, %c0_71, %c0_72], %220 {strides = array<i32>} : memref<8x8x128xf32, #tpu.memory_space<vmem>>, vector<1x8x128xf32>,
    %c6_i32 = arith.constant 6 : i32
    %221 = arith.index_cast %c6_i32 : i32 to index
    %c0_73 = arith.constant 0 : index
    %c0_74 = arith.constant 0 : index
    %222 = vector.load %arg9[%221, %c0_73, %c0_74] : memref<8x8x512xf32, #tpu.memory_space<vmem>>, vector<1x8x512xf32>
    %223 = vector.shape_cast %222 : vector<1x8x512xf32> to vector<8x512xf32>
    %c0_75 = arith.constant 0 : index
    %c0_76 = arith.constant 0 : index
    %224 = vector.load %arg4[%c0_75, %c0_76] : memref<128x512xf32, #tpu.memory_space<vmem>>, vector<128x512xf32>
    %cst_77 = arith.constant dense<0.000000e+00> : vector<8x512xf32>
    %225 = tpu.matmul %216, %224, %cst_77 {dimension_numbers = #tpu.dot_dimension_numbers<[1], [0], [0], [1], [0, 0, 1, 1], [], []>} : vector<8x128xf32>, vector<128x512xf32>, vector<8x512xf32> -> vector<8x512xf32>
    %226 = arith.addf %223, %225 : vector<8x512xf32>
    %227 = vector.extract_strided_slice %226 {offsets = [0, 0], sizes = [8, 128], strides = [1, 1]} : vector<8x512xf32> to vector<8x128xf32>
    %228 = arith.negf %227 : vector<8x128xf32>
    %229 = math.exp %228 : vector<8x128xf32>
    %cst_78 = arith.constant 1.000000e+00 : f32
    %230 = vector.broadcast %cst_78 : f32 to vector<8x128xf32>
    %231 = arith.addf %230, %229 : vector<8x128xf32>
    %232 = arith.divf %230, %231 : vector<8x128xf32>
    %233 = vector.extract_strided_slice %226 {offsets = [0, 128], sizes = [8, 128], strides = [1, 1]} : vector<8x512xf32> to vector<8x128xf32>
    %234 = arith.negf %233 : vector<8x128xf32>
    %235 = math.exp %234 : vector<8x128xf32>
    %cst_79 = arith.constant 1.000000e+00 : f32
    %236 = vector.broadcast %cst_79 : f32 to vector<8x128xf32>
    %237 = arith.addf %236, %235 : vector<8x128xf32>
    %238 = arith.divf %236, %237 : vector<8x128xf32>
    %239 = vector.extract_strided_slice %226 {offsets = [0, 256], sizes = [8, 128], strides = [1, 1]} : vector<8x512xf32> to vector<8x128xf32>
    %240 = math.tanh %239 : vector<8x128xf32>
    %241 = vector.extract_strided_slice %226 {offsets = [0, 384], sizes = [8, 128], strides = [1, 1]} : vector<8x512xf32> to vector<8x128xf32>
    %242 = arith.negf %241 : vector<8x128xf32>
    %243 = math.exp %242 : vector<8x128xf32>
    %cst_80 = arith.constant 1.000000e+00 : f32
    %244 = vector.broadcast %cst_80 : f32 to vector<8x128xf32>
    %245 = arith.addf %244, %243 : vector<8x128xf32>
    %246 = arith.divf %244, %245 : vector<8x128xf32>
    %247 = arith.mulf %238, %214 : vector<8x128xf32>
    %248 = arith.mulf %232, %240 : vector<8x128xf32>
    %249 = arith.addf %247, %248 : vector<8x128xf32>
    %250 = math.tanh %249 : vector<8x128xf32>
    %251 = arith.mulf %246, %250 : vector<8x128xf32>
    %252 = arith.index_cast %c6_i32 : i32 to index
    %c0_81 = arith.constant 0 : index
    %c0_82 = arith.constant 0 : index
    %253 = vector.load %arg10[%252, %c0_81, %c0_82] : memref<8x8x128xf32, #tpu.memory_space<vmem>>, vector<1x8x128xf32>
    %254 = vector.shape_cast %253 : vector<1x8x128xf32> to vector<8x128xf32>
    %255 = vector.shape_cast %251 : vector<8x128xf32> to vector<1x8x128xf32>
    tpu.vector_store %arg10[%252, %c0_81, %c0_82], %255 {strides = array<i32>} : memref<8x8x128xf32, #tpu.memory_space<vmem>>, vector<1x8x128xf32>,
    %c7_i32 = arith.constant 7 : i32
    %256 = arith.index_cast %c7_i32 : i32 to index
    %c0_83 = arith.constant 0 : index
    %c0_84 = arith.constant 0 : index
    %257 = vector.load %arg9[%256, %c0_83, %c0_84] : memref<8x8x512xf32, #tpu.memory_space<vmem>>, vector<1x8x512xf32>
    %258 = vector.shape_cast %257 : vector<1x8x512xf32> to vector<8x512xf32>
    %c0_85 = arith.constant 0 : index
    %c0_86 = arith.constant 0 : index
    %259 = vector.load %arg4[%c0_85, %c0_86] : memref<128x512xf32, #tpu.memory_space<vmem>>, vector<128x512xf32>
    %cst_87 = arith.constant dense<0.000000e+00> : vector<8x512xf32>
    %260 = tpu.matmul %251, %259, %cst_87 {dimension_numbers = #tpu.dot_dimension_numbers<[1], [0], [0], [1], [0, 0, 1, 1], [], []>} : vector<8x128xf32>, vector<128x512xf32>, vector<8x512xf32> -> vector<8x512xf32>
    %261 = arith.addf %258, %260 : vector<8x512xf32>
    %262 = vector.extract_strided_slice %261 {offsets = [0, 0], sizes = [8, 128], strides = [1, 1]} : vector<8x512xf32> to vector<8x128xf32>
    %263 = arith.negf %262 : vector<8x128xf32>
    %264 = math.exp %263 : vector<8x128xf32>
    %cst_88 = arith.constant 1.000000e+00 : f32
    %265 = vector.broadcast %cst_88 : f32 to vector<8x128xf32>
    %266 = arith.addf %265, %264 : vector<8x128xf32>
    %267 = arith.divf %265, %266 : vector<8x128xf32>
    %268 = vector.extract_strided_slice %261 {offsets = [0, 128], sizes = [8, 128], strides = [1, 1]} : vector<8x512xf32> to vector<8x128xf32>
    %269 = arith.negf %268 : vector<8x128xf32>
    %270 = math.exp %269 : vector<8x128xf32>
    %cst_89 = arith.constant 1.000000e+00 : f32
    %271 = vector.broadcast %cst_89 : f32 to vector<8x128xf32>
    %272 = arith.addf %271, %270 : vector<8x128xf32>
    %273 = arith.divf %271, %272 : vector<8x128xf32>
    %274 = vector.extract_strided_slice %261 {offsets = [0, 256], sizes = [8, 128], strides = [1, 1]} : vector<8x512xf32> to vector<8x128xf32>
    %275 = math.tanh %274 : vector<8x128xf32>
    %276 = vector.extract_strided_slice %261 {offsets = [0, 384], sizes = [8, 128], strides = [1, 1]} : vector<8x512xf32> to vector<8x128xf32>
    %277 = arith.negf %276 : vector<8x128xf32>
    %278 = math.exp %277 : vector<8x128xf32>
    %cst_90 = arith.constant 1.000000e+00 : f32
    %279 = vector.broadcast %cst_90 : f32 to vector<8x128xf32>
    %280 = arith.addf %279, %278 : vector<8x128xf32>
    %281 = arith.divf %279, %280 : vector<8x128xf32>
    %282 = arith.mulf %273, %249 : vector<8x128xf32>
    %283 = arith.mulf %267, %275 : vector<8x128xf32>
    %284 = arith.addf %282, %283 : vector<8x128xf32>
    %285 = math.tanh %284 : vector<8x128xf32>
    %286 = arith.mulf %281, %285 : vector<8x128xf32>
    %287 = arith.index_cast %c7_i32 : i32 to index
    %c0_91 = arith.constant 0 : index
    %c0_92 = arith.constant 0 : index
    %288 = vector.load %arg10[%287, %c0_91, %c0_92] : memref<8x8x128xf32, #tpu.memory_space<vmem>>, vector<1x8x128xf32>
    %289 = vector.shape_cast %288 : vector<1x8x128xf32> to vector<8x128xf32>
    %290 = vector.shape_cast %286 : vector<8x128xf32> to vector<1x8x128xf32>
    tpu.vector_store %arg10[%287, %c0_91, %c0_92], %290 {strides = array<i32>} : memref<8x8x128xf32, #tpu.memory_space<vmem>>, vector<1x8x128xf32>,
    %c8_i32 = arith.constant 8 : i32
    %c0_93 = arith.constant 0 : index
    %c0_94 = arith.constant 0 : index
    %c0_95 = arith.constant 0 : index
    %291 = vector.load %arg10[%c0_93, %c0_94, %c0_95] : memref<8x8x128xf32, #tpu.memory_space<vmem>>, vector<8x8x128xf32>
    %292 = vector.shape_cast %291 : vector<8x8x128xf32> to vector<64x128xf32>
    %c0_96 = arith.constant 0 : index
    %c0_97 = arith.constant 0 : index
    %293 = vector.load %arg6[%c0_96, %c0_97] : memref<128x128xf32, #tpu.memory_space<vmem>>, vector<128x128xf32>
    %cst_98 = arith.constant dense<0.000000e+00> : vector<64x128xf32>
    %294 = tpu.matmul %292, %293, %cst_98 {dimension_numbers = #tpu.dot_dimension_numbers<[1], [0], [0], [1], [0, 0, 1, 1], [], []>} : vector<64x128xf32>, vector<128x128xf32>, vector<64x128xf32> -> vector<64x128xf32>
    %c0_99 = arith.constant 0 : index
    %c0_100 = arith.constant 0 : index
    %295 = vector.load %arg7[%c0_99, %c0_100] : memref<1x128xf32, #tpu.memory_space<vmem>>, vector<1x128xf32>
    %296 = vector.broadcast %295 : vector<1x128xf32> to vector<64x128xf32>
    %297 = arith.addf %294, %296 : vector<64x128xf32>
    %298 = vector.shape_cast %297 : vector<64x128xf32> to vector<8x8x128xf32>
    %c0_101 = arith.constant 0 : index
    %c0_102 = arith.constant 0 : index
    %c0_103 = arith.constant 0 : index
    %299 = vector.load %arg8[%c0_101, %c0_102, %c0_103] : memref<8x8x128xf32, #tpu.memory_space<vmem>>, vector<8x8x128xf32>
    tpu.vector_store %arg8[%c0_101, %c0_102, %c0_103], %298 {strides = array<i32>} : memref<8x8x128xf32, #tpu.memory_space<vmem>>, vector<8x8x128xf32>,
    return
  }
}

</mosaic_0001>

<bundles_post_ra>
// kernel: decoder_rnn_forward.1
= control target key start
LH: loop header
LB: loop body
LE: loop exit
PB: predicated region body
PF: predicated region fallthrough
CT: control target
= control target key end

     0   :  { %v3351_v3 = vmov 0.0   ;;  %s4782_s3 = inlined_call_operand.vmem [shape: f32[128,512], index: 3, kind: input, shape index: {}]   ;;  %s4783_s4 = inlined_call_operand.vmem [shape: f32[128,512], index: 4, kind: input, shape index: {}]   ;;  %s4784_s0 = inlined_call_operand.vmem [shape: f32[8,8,128], index: 0, kind: input, shape index: {}]   ;;  %s4785_s1 = inlined_call_operand.vmem [shape: f32[8,128], index: 1, kind: input, shape index: {}]   ;;  %s4786_s5 = inlined_call_operand.vmem [shape: f32[1,512], index: 5, kind: input, shape index: {}]   ;;  %s4787_s2 = inlined_call_operand.vmem [shape: f32[8,128], index: 2, kind: input, shape index: {}]   ;;  %s4788_s6 = inlined_call_operand.vmem [shape: f32[128,128], index: 6, kind: input, shape index: {}]   ;;  %s4789_s7 = inlined_call_operand.vmem [shape: f32[1,128], index: 7, kind: input, shape index: {}]   ;;  %s4790_s8 = inlined_call_operand.vmem [shape: f32[8,8,128], index: 8, kind: output, shape index: {}]  }
   0x1   :  { %v38_v0 = vld [vmem:[%s4782_s3 + $0x8] sm:$0xff]  ;;  %v37_v2 = vld [vmem:[%s4782_s3] sm:$0xff]  ;;  %187 = vmatprep.mubr.f32.mxu1 %v3351_v3  ;;  %515 = vmatprep.mubr.f32.mxu0 %v3351_v3 }
   0x2   :  { %v42_v1 = vld [vmem:[%s4782_s3 + $0x28] sm:$0xff]  ;;  %v41_v5 = vld [vmem:[%s4782_s3 + $0x20] sm:$0xff] }
   0x3   :  { %v2550_v4 = vpack.c.bf16 %v42_v1, %v38_v0  ;;  %v388_v6 = vld [vmem:[%s4783_s4 + $0x8] sm:$0xff]  ;;  %v2552_v8 = vpack.c.bf16 %v41_v5, %v37_v2  ;;  %v387_v10 = vld [vmem:[%s4783_s4] sm:$0xff] }
   0x4   :  { %v392_v7 = vld [vmem:[%s4783_s4 + $0x28] sm:$0xff]  ;;  %v391_v11 = vld [vmem:[%s4783_s4 + $0x20] sm:$0xff] }
   0x5   :  { %v3417_v9 = vpack.c.bf16 %v392_v7, %v388_v6  ;;  %v46_v12 = vld [vmem:[%s4782_s3 + $0x48] sm:$0xff]  ;;  %2551 = vmatprep.subr.bf16.mxu1 %v2550_v4  ;;  %v3428_v13 = vpack.c.bf16 %v391_v11, %v387_v10  ;;  %v45_v15 = vld [vmem:[%s4782_s3 + $0x40] sm:$0xff] }
   0x6   :  { %v50_v14 = vld [vmem:[%s4782_s3 + $0x68] sm:$0xff]  ;;  %v49_v16 = vld [vmem:[%s4782_s3 + $0x60] sm:$0xff]  ;;  %2553 = vmatpush1.bf16.msra.mxu1 %v2552_v8 }
   0x7   :  { %2615 = vmatprep.subr.bf16.mxu0 %v3417_v9  ;;  %v2554_v17 = vpack.c.bf16 %v50_v14, %v46_v12  ;;  %v2556_v18 = vpack.c.bf16 %v49_v16, %v45_v15  ;;  %v396_v19 = vld [vmem:[%s4783_s4 + $0x48] sm:$0xff]  ;;  %v395_v21 = vld [vmem:[%s4783_s4 + $0x40] sm:$0xff] }
   0x8   :  { %v400_v20 = vld [vmem:[%s4783_s4 + $0x68] sm:$0xff]  ;;  %2617 = vmatpush1.bf16.msra.mxu0 %v3428_v13  ;;  %v399_v23 = vld [vmem:[%s4783_s4 + $0x60] sm:$0xff] }
   0x9   :  { %v3450_v22 = vpack.c.bf16 %v400_v20, %v396_v19  ;;  %v54_v24 = vld [vmem:[%s4782_s3 + $0x88] sm:$0xff]  ;;  %2555 = vmatprep.subr.bf16.mxu1 %v2554_v17  ;;  %v3461_v26 = vpack.c.bf16 %v399_v23, %v395_v21  ;;  %v53_v28 = vld [vmem:[%s4782_s3 + $0x80] sm:$0xff] }
   0xa   :  { %v58_v25 = vld [vmem:[%s4782_s3 + $0xa8] sm:$0xff]  ;;  %v57_v29 = vld [vmem:[%s4782_s3 + $0xa0] sm:$0xff]  ;;  %2557 = vmatpush1.bf16.msra.mxu1 %v2556_v18 }
   0xb   :  { %v2558_v27 = vpack.c.bf16 %v58_v25, %v54_v24  ;;  %v404_v30 = vld [vmem:[%s4783_s4 + $0x88] sm:$0xff]  ;;  %2619 = vmatprep.subr.bf16.mxu0 %v3450_v22  ;;  %v403_v32 = vld [vmem:[%s4783_s4 + $0x80] sm:$0xff]  ;;  %v2560_v34 = vpack.c.bf16 %v57_v29, %v53_v28 }
   0xc   :  { %v408_v31 = vld [vmem:[%s4783_s4 + $0xa8] sm:$0xff]  ;;  %v407_v33 = vld [vmem:[%s4783_s4 + $0xa0] sm:$0xff]  ;;  %2621 = vmatpush1.bf16.msra.mxu0 %v3461_v26 }
   0xd   :  { %v3482_v35 = vpack.c.bf16 %v408_v31, %v404_v30  ;;  %v62_v36 = vld [vmem:[%s4782_s3 + $0xc8] sm:$0xff]  ;;  %v61_v38 = vld [vmem:[%s4782_s3 + $0xc0] sm:$0xff]  ;;  %2559 = vmatprep.subr.bf16.mxu1 %v2558_v27  ;;  %v3494_v39 = vpack.c.bf16 %v407_v33, %v403_v32 }
   0xe   :  { %v66_v37 = vld [vmem:[%s4782_s3 + $0xe8] sm:$0xff]  ;;  %v65_v41 = vld [vmem:[%s4782_s3 + $0xe0] sm:$0xff]  ;;  %2561 = vmatpush1.bf16.msra.mxu1 %v2560_v34 }
   0xf   :  { %v2562_v40 = vpack.c.bf16 %v66_v37, %v62_v36  ;;  %v412_v42 = vld [vmem:[%s4783_s4 + $0xc8] sm:$0xff]  ;;  %2623 = vmatprep.subr.bf16.mxu0 %v3482_v35  ;;  %v411_v45 = vld [vmem:[%s4783_s4 + $0xc0] sm:$0xff]  ;;  %v2564_v49 = vpack.c.bf16 %v65_v41, %v61_v38  ;;  %v40_v37 = vld [vmem:[%s4782_s3 + $0x18] sm:$0xff] }
  0x10   :  { %v416_v43 = vld [vmem:[%s4783_s4 + $0xe8] sm:$0xff]  ;;  %v415_v46 = vld [vmem:[%s4783_s4 + $0xe0] sm:$0xff]  ;;  %2625 = vmatpush1.bf16.msra.mxu0 %v3494_v39  ;;  %v44_v38 = vld [vmem:[%s4782_s3 + $0x38] sm:$0xff] }
  0x11   :  { %v3506_v44 = vpack.c.bf16 %v416_v43, %v412_v42  ;;  %v70_v47 = vld [vmem:[%s4782_s3 + $0x108] sm:$0xff]  ;;  %2563 = vmatprep.subr.bf16.mxu1 %v2562_v40  ;;  %v3527_v52 = vpack.c.bf16 %v415_v46, %v411_v45  ;;  %v69_v54 = vld [vmem:[%s4782_s3 + $0x100] sm:$0xff]  ;;  %v2582_v42 = vpack.c.bf16 %v44_v38, %v40_v37  ;;  %v39_v43 = vld [vmem:[%s4782_s3 + $0x10] sm:$0xff] }
  0x12   :  { %v74_v48 = vld [vmem:[%s4782_s3 + $0x128] sm:$0xff]  ;;  %v73_v55 = vld [vmem:[%s4782_s3 + $0x120] sm:$0xff]  ;;  %2565 = vmatpush1.bf16.msra.mxu1 %v2564_v49  ;;  %v43_v45 = vld [vmem:[%s4782_s3 + $0x30] sm:$0xff] }
  0x13   :  { %v420_v50 = vld [vmem:[%s4783_s4 + $0x108] sm:$0xff]  ;;  %v2566_v53 = vpack.c.bf16 %v74_v48, %v70_v47  ;;  %v419_v56 = vld [vmem:[%s4783_s4 + $0x100] sm:$0xff]  ;;  %2627 = vmatprep.subr.bf16.mxu0 %v3506_v44  ;;  %v2568_v63 = vpack.c.bf16 %v73_v55, %v69_v54  ;;  %v48_v46 = vld [vmem:[%s4782_s3 + $0x58] sm:$0xff]  ;;  %v2584_v49 = vpack.c.bf16 %v43_v45, %v39_v43 }
  0x14   :  { %v424_v51 = vld [vmem:[%s4783_s4 + $0x128] sm:$0xff]  ;;  %v423_v58 = vld [vmem:[%s4783_s4 + $0x120] sm:$0xff]  ;;  %2629 = vmatpush1.bf16.msra.mxu0 %v3527_v52  ;;  %v52_v47 = vld [vmem:[%s4782_s3 + $0x78] sm:$0xff] }
  0x15   :  { %v3539_v57 = vpack.c.bf16 %v424_v51, %v420_v50  ;;  %v78_v59 = vld [vmem:[%s4782_s3 + $0x148] sm:$0xff]  ;;  %2567 = vmatprep.subr.bf16.mxu1 %v2566_v53  ;;  %v3557_v0 = vpack.c.bf16 %v423_v58, %v419_v56  ;;  %v77_v2 = vld [vmem:[%s4782_s3 + $0x140] sm:$0xff]  ;;  %v2586_v51 = vpack.c.bf16 %v52_v47, %v48_v46  ;;  %v47_v53 = vld [vmem:[%s4782_s3 + $0x50] sm:$0xff] }
  0x16   :  { %v82_v60 = vld [vmem:[%s4782_s3 + $0x168] sm:$0xff]  ;;  %v81_v4 = vld [vmem:[%s4782_s3 + $0x160] sm:$0xff]  ;;  %2569 = vmatpush1.bf16.msra.mxu1 %v2568_v63  ;;  %v51_v54 = vld [vmem:[%s4782_s3 + $0x70] sm:$0xff] }
  0x17   :  { %v428_v61 = vld [vmem:[%s4783_s4 + $0x148] sm:$0xff]  ;;  %v2570_v1 = vpack.c.bf16 %v82_v60, %v78_v59  ;;  %v427_v5 = vld [vmem:[%s4783_s4 + $0x140] sm:$0xff]  ;;  %2631 = vmatprep.subr.bf16.mxu0 %v3539_v57  ;;  %v2572_v14 = vpack.c.bf16 %v81_v4, %v77_v2  ;;  %v56_v55 = vld [vmem:[%s4782_s3 + $0x98] sm:$0xff]  ;;  %v2588_v59 = vpack.c.bf16 %v51_v54, %v47_v53 }
  0x18   :  { %v432_v62 = vld [vmem:[%s4783_s4 + $0x168] sm:$0xff]  ;;  %v431_v7 = vld [vmem:[%s4783_s4 + $0x160] sm:$0xff]  ;;  %2633 = vmatpush1.bf16.msra.mxu0 %v3557_v0  ;;  %v60_v56 = vld [vmem:[%s4782_s3 + $0xb8] sm:$0xff] }
  0x19   :  { %v3569_v6 = vpack.c.bf16 %v432_v62, %v428_v61  ;;  %v86_v8 = vld [vmem:[%s4782_s3 + $0x188] sm:$0xff]  ;;  %2571 = vmatprep.subr.bf16.mxu1 %v2570_v1  ;;  %v3587_v15 = vpack.c.bf16 %v431_v7, %v427_v5  ;;  %v85_v17 = vld [vmem:[%s4782_s3 + $0x180] sm:$0xff]  ;;  %v2590_v60 = vpack.c.bf16 %v60_v56, %v56_v55  ;;  %v55_v61 = vld [vmem:[%s4782_s3 + $0x90] sm:$0xff] }
  0x1a   :  { %v90_v10 = vld [vmem:[%s4782_s3 + $0x1a8] sm:$0xff]  ;;  %v89_v18 = vld [vmem:[%s4782_s3 + $0x1a0] sm:$0xff]  ;;  %2573 = vmatpush1.bf16.msra.mxu1 %v2572_v14  ;;  %v64_v62 = vld [vmem:[%s4782_s3 + $0xd8] sm:$0xff] }
  0x1b   :  { %v436_v11 = vld [vmem:[%s4783_s4 + $0x188] sm:$0xff]  ;;  %v2574_v16 = vpack.c.bf16 %v90_v10, %v86_v8  ;;  %v435_v19 = vld [vmem:[%s4783_s4 + $0x180] sm:$0xff]  ;;  %2635 = vmatprep.subr.bf16.mxu0 %v3569_v6  ;;  %v2576_v28 = vpack.c.bf16 %v89_v18, %v85_v17  ;;  %v68_v63 = vld [vmem:[%s4782_s3 + $0xf8] sm:$0xff] }
  0x1c   :  { %v440_v12 = vld [vmem:[%s4783_s4 + $0x1a8] sm:$0xff]  ;;  %v439_v21 = vld [vmem:[%s4783_s4 + $0x1a0] sm:$0xff]  ;;  %2637 = vmatpush1.bf16.msra.mxu0 %v3587_v15  ;;  %v3708_v1 = vld [vmem:[%s4784_s0 + $0x10] sm:$0xff]  ;;  %v2594_v4 = vpack.c.bf16 %v68_v63, %v64_v62 }
  0x1d   :  { %v3599_v20 = vpack.c.bf16 %v440_v12, %v436_v11  ;;  %v94_v23 = vld [vmem:[%s4782_s3 + $0x1c8] sm:$0xff]  ;;  %2575 = vmatprep.subr.bf16.mxu1 %v2574_v16  ;;  %v3617_v29 = vpack.c.bf16 %v439_v21, %v435_v19  ;;  %v93_v31 = vld [vmem:[%s4782_s3 + $0x1c0] sm:$0xff]  ;;  %v67_v5 = vld [vmem:[%s4782_s3 + $0xf0] sm:$0xff] }
  0x1e   :  { %v98_v24 = vld [vmem:[%s4782_s3 + $0x1e8] sm:$0xff]  ;;  %v97_v32 = vld [vmem:[%s4782_s3 + $0x1e0] sm:$0xff]  ;;  %2577 = vmatpush1.bf16.msra.mxu1 %v2576_v28  ;;  %v76_v7 = vld [vmem:[%s4782_s3 + $0x138] sm:$0xff] }
  0x1f   :  { %v444_v25 = vld [vmem:[%s4783_s4 + $0x1c8] sm:$0xff]  ;;  %v2578_v30 = vpack.c.bf16 %v98_v24, %v94_v23  ;;  %v443_v33 = vld [vmem:[%s4783_s4 + $0x1c0] sm:$0xff]  ;;  %2639 = vmatprep.subr.bf16.mxu0 %v3599_v20  ;;  %v2580_v40 = vpack.c.bf16 %v97_v32, %v93_v31  ;;  %v3729_v8 = vld [vmem:[%s4784_s0 + $0x18] sm:$0xff] }
  0x20   :  { %v448_v27 = vld [vmem:[%s4783_s4 + $0x1e8] sm:$0xff]  ;;  %v447_v36 = vld [vmem:[%s4783_s4 + $0x1e0] sm:$0xff]  ;;  %2641 = vmatpush1.bf16.msra.mxu0 %v3617_v29  ;;  %v71_v12 = vld [vmem:[%s4782_s3 + $0x110] sm:$0xff] }
  0x21   :  { %v3629_v34 = vpack.c.bf16 %v448_v27, %v444_v25  ;;  %2579 = vmatprep.subr.bf16.mxu1 %v2578_v30  ;;  %v3641_v41 = vpack.c.bf16 %v447_v36, %v443_v33  ;;  %v3659_v48 = vld [vmem:[%s4784_s0] sm:$0xff]  ;;  %v3685_v58 = vld [vmem:[%s4784_s0 + $0x8] sm:$0xff]  ;;  %v84_v14 = vld [vmem:[%s4782_s3 + $0x178] sm:$0xff] }
  0x22   :  { %2581 = vmatpush1.bf16.msra.mxu1 %v2580_v40  ;;  %v3665_v50 = vld [vmem:[%s4785_s1] sm:$0xff]  ;;  %v79_v19 = vld [vmem:[%s4782_s3 + $0x150] sm:$0xff]  ;;  %v92_v21 = vld [vmem:[%s4782_s3 + $0x1b8] sm:$0xff] }
  0x23   :  { %2643 = vmatprep.subr.bf16.mxu0 %v3629_v34  ;;  %2583 = vmatprep.subr.bf16.mxu1 %v2582_v42  ;;  %v3750_v16 = vld [vmem:[%s4784_s0 + $0x20] sm:$0xff]  ;;  %v3771_v23 = vld [vmem:[%s4784_s0 + $0x28] sm:$0xff]  ;;  %v87_v27 = vld [vmem:[%s4782_s3 + $0x190] sm:$0xff] }
  0x24   :  { %2645 = vmatpush1.bf16.msra.mxu0 %v3641_v41  ;;  %v100_v28 = vld [vmem:[%s4782_s3 + $0x1f8] sm:$0xff]  ;;  %v3792_v30 = vld [vmem:[%s4784_s0 + $0x30] sm:$0xff] }
  0x25   :  { %2679 = vmatprep.subr.bf16.mxu0 %v3417_v9  ;;  %188 = vmatmul.mubr.f32.vlgmr.msra.gmra.mrb[0].mxu1 %v3659_v48  ;;  %v59_v9 = vld [vmem:[%s4782_s3 + $0xb0] sm:$0xff]  ;;  %v394_v36 = vld [vmem:[%s4783_s4 + $0x38] sm:$0xff] }
  0x26   :  { %2585 = vmatpush1.bf16.msra.mxu1 %v2584_v49  ;;  %193 = vmatprep.mubr.f32.mxu1 %v3351_v3  ;;  %v2592_v2 = vpack.c.bf16 %v59_v9, %v55_v61  ;;  %v95_v33 = vld [vmem:[%s4782_s3 + $0x1d0] sm:$0xff]  ;;  %v3813_v37 = vld [vmem:[%s4784_s0 + $0x38] sm:$0xff] }
  0x27   :  { %516 = vmatmul.mubr.f32.vlgmr.msra.gmra.mrb[0].mxu0 %v3665_v50  ;;  %2587 = vmatprep.subr.bf16.mxu1 %v2586_v51  ;;  %v398_v42 = vld [vmem:[%s4783_s4 + $0x58] sm:$0xff]  ;;  %v397_v47 = vld [vmem:[%s4783_s4 + $0x50] sm:$0xff] }
  0x28   :  { %2681 = vmatpush1.bf16.msra.mxu0 %v3428_v13  ;;  %755 = vmatprep.mubr.f32.mxu0 %v3351_v3  ;;  %v63_v13 = vld [vmem:[%s4782_s3 + $0xd0] sm:$0xff]  ;;  %v402_v43 = vld [vmem:[%s4783_s4 + $0x78] sm:$0xff] }
  0x29   :  { %194 = vmatmul.mubr.f32.gmra.mrb[2].mxu1 %v3685_v58  ;;  %2683 = vmatprep.subr.bf16.mxu0 %v3450_v22  ;;  %v72_v22 = vld [vmem:[%s4782_s3 + $0x118] sm:$0xff]  ;;  %v2596_v10 = vpack.c.bf16 %v67_v5, %v63_v13  ;;  %v3836_v46 = vpack.c.bf16 %v402_v43, %v398_v42  ;;  %v405_v54 = vld [vmem:[%s4783_s4 + $0x90] sm:$0xff] }
  0x2a   :  { %2589 = vmatpush1.bf16.msra.mxu1 %v2588_v59  ;;  %199 = vmatprep.mubr.f32.mxu1 %v3351_v3  ;;  %v2598_v11 = vpack.c.bf16 %v76_v7, %v72_v22  ;;  %v410_v49 = vld [vmem:[%s4783_s4 + $0xb8] sm:$0xff]  ;;  %v417_v61 = vld [vmem:[%s4783_s4 + $0xf0] sm:$0xff] }
  0x2b   :  { %2591 = vmatprep.subr.bf16.mxu1 %v2590_v60  ;;  %v418_v55 = vld [vmem:[%s4783_s4 + $0xf8] sm:$0xff]  ;;  %v413_v60 = vld [vmem:[%s4783_s4 + $0xd0] sm:$0xff] }
  0x2c   :  { %2685 = vmatpush1.bf16.msra.mxu0 %v3461_v26  ;;  %v75_v26 = vld [vmem:[%s4782_s3 + $0x130] sm:$0xff]  ;;  %v426_v9 = vld [vmem:[%s4783_s4 + $0x138] sm:$0xff]  ;;  %v3894_v62 = vpack.c.bf16 %v417_v61, %v413_v60 }
  0x2d   :  { %200 = vmatmul.mubr.f32.gmra.mrb[4].mxu1 %v3708_v1  ;;  %2687 = vmatprep.subr.bf16.mxu0 %v3482_v35  ;;  %v80_v35 = vld [vmem:[%s4782_s3 + $0x158] sm:$0xff]  ;;  %v2600_v17 = vpack.c.bf16 %v75_v26, %v71_v12  ;;  %v429_v7 = vld [vmem:[%s4783_s4 + $0x150] sm:$0xff] }
  0x2e   :  { %2593 = vmatpush1.bf16.msra.mxu1 %v2592_v2  ;;  %205 = vmatprep.mubr.f32.mxu1 %v3351_v3  ;;  %v2602_v18 = vpack.c.bf16 %v84_v14, %v80_v35  ;;  %v421_v2 = vld [vmem:[%s4783_s4 + $0x110] sm:$0xff]  ;;  %v434_v13 = vld [vmem:[%s4783_s4 + $0x178] sm:$0xff] }
  0x2f   :  { %2595 = vmatprep.subr.bf16.mxu1 %v2594_v4  ;;  %v425_v4 = vld [vmem:[%s4783_s4 + $0x130] sm:$0xff] }
  0x30   :  { %2689 = vmatpush1.bf16.msra.mxu0 %v3494_v39  ;;  %v83_v39 = vld [vmem:[%s4782_s3 + $0x170] sm:$0xff]  ;;  %v3914_v5 = vpack.c.bf16 %v425_v4, %v421_v2 }
  0x31   :  { %206 = vmatmul.mubr.f32.gmra.mrb[6].mxu1 %v3729_v8  ;;  %2691 = vmatprep.subr.bf16.mxu0 %v3506_v44  ;;  %v88_v44 = vld [vmem:[%s4782_s3 + $0x198] sm:$0xff]  ;;  %v2604_v24 = vpack.c.bf16 %v83_v39, %v79_v19  ;;  %v437_v35 = vld [vmem:[%s4783_s4 + $0x190] sm:$0xff] }
  0x32   :  { %2597 = vmatpush1.bf16.msra.mxu1 %v2596_v10  ;;  %211 = vmatprep.mubr.f32.mxu1 %v3351_v3  ;;  %v2606_v25 = vpack.c.bf16 %v92_v21, %v88_v44  ;;  %v433_v10 = vld [vmem:[%s4783_s4 + $0x170] sm:$0xff] }
  0x33   :  { %2599 = vmatprep.subr.bf16.mxu1 %v2598_v11  ;;  %v442_v11 = vld [vmem:[%s4783_s4 + $0x1b8] sm:$0xff]  ;;  %v3934_v12 = vpack.c.bf16 %v433_v10, %v429_v7  ;;  %v441_v14 = vld [vmem:[%s4783_s4 + $0x1b0] sm:$0xff] }
  0x34   :  { %2693 = vmatpush1.bf16.msra.mxu0 %v3527_v52  ;;  %v91_v52 = vld [vmem:[%s4782_s3 + $0x1b0] sm:$0xff] }
  0x35   :  { %212 = vmatmul.mubr.f32.gmra.mrb[8].mxu1 %v3750_v16  ;;  %2695 = vmatprep.subr.bf16.mxu0 %v3539_v57  ;;  %v96_v57 = vld [vmem:[%s4782_s3 + $0x1d8] sm:$0xff]  ;;  %v2608_v31 = vpack.c.bf16 %v91_v52, %v87_v27  ;;  %v445_v39 = vld [vmem:[%s4783_s4 + $0x1d0] sm:$0xff] }
  0x36   :  { %2601 = vmatpush1.bf16.msra.mxu1 %v2600_v17  ;;  %217 = vmatprep.mubr.f32.mxu1 %v3351_v3  ;;  %v2610_v32 = vpack.c.bf16 %v100_v28, %v96_v57  ;;  %v450_v17 = vld [vmem:[%s4783_s4 + $0x1f8] sm:$0xff]  ;;  %v449_v44 = vld [vmem:[%s4783_s4 + $0x1f0] sm:$0xff] }
  0x37   :  { %2603 = vmatprep.subr.bf16.mxu1 %v2602_v18  ;;  %v3954_v18 = vpack.c.bf16 %v441_v14, %v437_v35  ;;  %v3968_v21 = vpack.c.bf16 %v449_v44, %v445_v39 }
  0x38   :  { %2697 = vmatpush1.bf16.msra.mxu0 %v3557_v0  ;;  %v99_v0 = vld [vmem:[%s4782_s3 + $0x1f0] sm:$0xff] }
  0x39   :  { %218 = vmatmul.mubr.f32.gmra.mrb[10].mxu1 %v3771_v23  ;;  %2699 = vmatprep.subr.bf16.mxu0 %v3569_v6  ;;  %v390_v6 = vld [vmem:[%s4783_s4 + $0x18] sm:$0xff]  ;;  %v2612_v38 = vpack.c.bf16 %v99_v0, %v95_v33 }
  0x3a   :  { %2605 = vmatpush1.bf16.msra.mxu1 %v2604_v24  ;;  %223 = vmatprep.mubr.f32.mxu1 %v3351_v3  ;;  %v3815_v40 = vpack.c.bf16 %v394_v36, %v390_v6 }
  0x3b   :  { %2607 = vmatprep.subr.bf16.mxu1 %v2606_v25  ;;  %v101_v25 = vld [vmem:[%s4786_s5] sm:$0xf] }
  0x3c   :  { %2701 = vmatpush1.bf16.msra.mxu0 %v3587_v15  ;;  %v389_v15 = vld [vmem:[%s4783_s4 + $0x10] sm:$0xff] }
  0x3d   :  { %224 = vmatmul.mubr.f32.gmra.mrb[12].mxu1 %v3792_v30  ;;  %2703 = vmatprep.subr.bf16.mxu0 %v3599_v20  ;;  %v393_v20 = vld [vmem:[%s4783_s4 + $0x30] sm:$0xff] }
  0x3e   :  { %2609 = vmatpush1.bf16.msra.mxu1 %v2608_v31  ;;  %229 = vmatprep.mubr.f32.mxu1 %v3351_v3  ;;  %v3833_v45 = vpack.c.bf16 %v393_v20, %v389_v15 }
  0x3f   :  { %2611 = vmatprep.subr.bf16.mxu1 %v2610_v32 }
  0x40   :  { %2705 = vmatpush1.bf16.msra.mxu0 %v3617_v29  ;;  %v401_v29 = vld [vmem:[%s4783_s4 + $0x70] sm:$0xff] }
  0x41   :  { %230 = vmatmul.mubr.f32.gmra.mrb[14].mxu1 %v3813_v37  ;;  %2707 = vmatprep.subr.bf16.mxu0 %v3629_v34  ;;  %v406_v34 = vld [vmem:[%s4783_s4 + $0x98] sm:$0xff]  ;;  %v3854_v51 = vpack.c.bf16 %v401_v29, %v397_v47 }
  0x42   :  { %2613 = vmatpush1.bf16.msra.mxu1 %v2612_v38  ;;  %300 = vmatprep.mubr.f32.mxu1 %v3351_v3  ;;  %v3857_v53 = vpack.c.bf16 %v410_v49, %v406_v34 }
  0x43   :  { %2647 = vmatprep.subr.bf16.mxu1 %v3815_v40 }
  0x44   :  { %2709 = vmatpush1.bf16.msra.mxu0 %v3641_v41  ;;  %v409_v41 = vld [vmem:[%s4783_s4 + $0xb0] sm:$0xff] }
  0x45   :  { %301 = vmatmul.mubr.f32.vlgmr.msra.gmra.mrb[16].mxu1 %v3659_v48  ;;  %v414_v48 = vld [vmem:[%s4783_s4 + $0xd8] sm:$0xff]  ;;  %v3874_v56 = vpack.c.bf16 %v409_v41, %v405_v54 }
  0x46   :  { %2649 = vmatpush1.bf16.msra.mxu1 %v3833_v45  ;;  %306 = vmatprep.mubr.f32.mxu1 %v3351_v3  ;;  %v3877_v59 = vpack.c.bf16 %v418_v55, %v414_v48 }
  0x47   :  { %2651 = vmatprep.subr.bf16.mxu1 %v3836_v46 }
  0x49   :  { %307 = vmatmul.mubr.f32.gmra.mrb[18].mxu1 %v3685_v58  ;;  %v422_v58 = vld [vmem:[%s4783_s4 + $0x118] sm:$0xff] }
  0x4a   :  { %2653 = vmatpush1.bf16.msra.mxu1 %v3854_v51  ;;  %312 = vmatprep.mubr.f32.mxu1 %v3351_v3  ;;  %v3897_v63 = vpack.c.bf16 %v426_v9, %v422_v58 }
  0x4b   :  { %2655 = vmatprep.subr.bf16.mxu1 %v3857_v53 }
  0x4d   :  { %313 = vmatmul.mubr.f32.gmra.mrb[20].mxu1 %v3708_v1  ;;  %v430_v1 = vld [vmem:[%s4783_s4 + $0x158] sm:$0xff] }
  0x4e   :  { %2657 = vmatpush1.bf16.msra.mxu1 %v3874_v56  ;;  %318 = vmatprep.mubr.f32.mxu1 %v3351_v3  ;;  %v3917_v22 = vpack.c.bf16 %v434_v13, %v430_v1 }
  0x4f   :  { %2659 = vmatprep.subr.bf16.mxu1 %v3877_v59 }
  0x51   :  { %319 = vmatmul.mubr.f32.gmra.mrb[22].mxu1 %v3729_v8  ;;  %v438_v8 = vld [vmem:[%s4783_s4 + $0x198] sm:$0xff] }
  0x52   :  { %2661 = vmatpush1.bf16.msra.mxu1 %v3894_v62  ;;  %324 = vmatprep.mubr.f32.mxu1 %v3351_v3  ;;  %v3937_v26 = vpack.c.bf16 %v442_v11, %v438_v8 }
  0x53   :  { %2663 = vmatprep.subr.bf16.mxu1 %v3897_v63 }
  0x55   :  { %325 = vmatmul.mubr.f32.gmra.mrb[24].mxu1 %v3750_v16  ;;  %v446_v16 = vld [vmem:[%s4783_s4 + $0x1d8] sm:$0xff] }
  0x56   :  { %2665 = vmatpush1.bf16.msra.mxu1 %v3914_v5  ;;  %330 = vmatprep.mubr.f32.mxu1 %v3351_v3  ;;  %v3957_v19 = vpack.c.bf16 %v450_v17, %v446_v16 }
  0x57   :  { %2667 = vmatprep.subr.bf16.mxu1 %v3917_v22 }
  0x59   :  { %331 = vmatmul.mubr.f32.gmra.mrb[26].mxu1 %v3771_v23 }
  0x5a   :  { %2669 = vmatpush1.bf16.msra.mxu1 %v3934_v12  ;;  %336 = vmatprep.mubr.f32.mxu1 %v3351_v3 }
  0x5b   :  { %2671 = vmatprep.subr.bf16.mxu1 %v3937_v26 }
  0x5d   :  { %337 = vmatmul.mubr.f32.gmra.mrb[28].mxu1 %v3792_v30 }
  0x5e   :  { %2673 = vmatpush1.bf16.msra.mxu1 %v3954_v18  ;;  %342 = vmatprep.mubr.f32.mxu1 %v3351_v3 }
  0x5f   :  { %2675 = vmatprep.subr.bf16.mxu1 %v3957_v19 }
  0x61   :  { %343 = vmatmul.mubr.f32.gmra.mrb[30].mxu1 %v3813_v37 }
  0x62   :  { %2677 = vmatpush1.bf16.msra.mxu1 %v3968_v21  ;;  %586 = vmatprep.mubr.f32.mxu1 %v3351_v3 }
  0x63   :  { %2711 = vmatprep.subr.bf16.mxu1 %v3815_v40 }
  0x65   :  { %587 = vmatmul.mubr.f32.vlgmr.msra.gmra.mrb[16].mxu1 %v3665_v50  ;;  %v103_v50 = vlaneseq }
  0x66   :  { %2713 = vmatpush1.bf16.msra.mxu1 %v3833_v45  ;;  %826 = vmatprep.mubr.f32.mxu1 %v3351_v3 }
  0x67   :  { %2715 = vmatprep.subr.bf16.mxu1 %v3836_v46  ;;  %v104_v23 = vshrl.u32 %v103_v50, 7 }
  0x69   :  { %v105_v24 = vsub.s32 0, %v104_v23  ;;  %v109_v27 = vsub.s32 1, %v104_v23  ;;  %v113_v39 = vsub.s32 2, %v104_v23  ;;  %v117_v50 = vsub.s32 3, %v104_v23  ;;  %v382_v23 = vld [vmem:[%s4787_s2] sm:$0xff] }
  0x6a   :  { %2717 = vmatpush1.bf16.msra.mxu1 %v3854_v51 }
  0x6b   :  { %2719 = vmatprep.subr.bf16.mxu1 %v3857_v53  ;;  %v106_v52 = vrot.slane %v101_v25, %v105_v24  ;;  %v110_v57 = vrot.slane %v101_v25, %v109_v27 }
  0x6e   :  { %2721 = vmatpush1.bf16.msra.mxu1 %v3874_v56 }
  0x6f   :  { %2723 = vmatprep.subr.bf16.mxu1 %v3877_v59 }
  0x72   :  { %2725 = vmatpush1.bf16.msra.mxu1 %v3894_v62 }
  0x73   :  { %2727 = vmatprep.subr.bf16.mxu1 %v3897_v63 }
  0x76   :  { %2729 = vmatpush1.bf16.msra.mxu1 %v3914_v5 }
  0x77   :  { %2731 = vmatprep.subr.bf16.mxu1 %v3917_v22 }
  0x7a   :  { %2733 = vmatpush1.bf16.msra.mxu1 %v3934_v12 }
  0x7b   :  { %2735 = vmatprep.subr.bf16.mxu1 %v3937_v26 }
  0x7e   :  { %2737 = vmatpush1.bf16.msra.mxu1 %v3954_v18 }
  0x7f   :  { %2739 = vmatprep.subr.bf16.mxu1 %v3957_v19 }
  0x82   :  { %2741 = vmatpush1.bf16.msra.mxu1 %v3968_v21 }
  0x83   :  { %2775 = vmatprep.subr.bf16.mxu1 %v3815_v40 }
  0xf8   :  { %v189_v28 = vpop.f32.mrb[0].mxu1 }
  0xf9   :  { %v190_v30 = vadd.f32 %v189_v28, %v106_v52  ;;  %v191_v31 = vpop.f32.mrb[1].mxu1  ;;  %v4024_v28 = vrot.slane %v101_v25, %v113_v39  ;;  %v880_v39 = vld [vmem:[%s4783_s4 + $0x60] sm:$0xff] }
  0xfa   :  { %v517_v32 = vpop.f32.mrb[0].mxu0  ;;  %v192_v33 = vadd.f32 %v191_v31, %v110_v57  ;;  %v4026_v31 = vrot.slane %v101_v25, %v117_v50  ;;  %v885_v50 = vld [vmem:[%s4783_s4 + $0x88] sm:$0xff] }
  0xfb   :  { %v519_v0 = vpop.f32.mrb[1].mxu0  ;;  %v593_v6 = vadd.f32 %v517_v32, %v190_v30 }
  0xfc   :  { %v594_v36 = vadd.f32 %v519_v0, %v192_v33  ;;  %v195_v37 = vpop.f32.mrb[2].mxu1 }
  0xfd   :  { %v3996_v38 = vadd.f32 %v195_v37, %v106_v52  ;;  %v197_v15 = vpop.f32.mrb[3].mxu1  ;;  %v2457_v17 = vmul.f32 -1.442695, %v593_v6 }
  0xfe   :  { %v3998_v20 = vadd.f32 %v197_v15, %v110_v57  ;;  %v2458_v16 = vmul.f32 -1.442695, %v594_v36 }
 0x100   :  { %v201_v42 = vpop.f32.mrb[4].mxu1  ;;  %3223 = vpow2.f32 %v2458_v16 }
 0x101   :  { %v4000_v43 = vadd.f32 %v201_v42, %v106_v52  ;;  %v203_v47 = vpop.f32.mrb[5].mxu1  ;;  %3225 = vpow2.f32 %v2457_v17  ;;  %v876_v17 = vld [vmem:[%s4783_s4 + $0x40] sm:$0xff] }
 0x102   :  { %v4002_v29 = vadd.f32 %v203_v47, %v110_v57 }
 0x104   :  { %v207_v34 = vpop.f32.mrb[6].mxu1 }
 0x105   :  { %v4004_v49 = vadd.f32 %v207_v34, %v106_v52  ;;  %v209_v54 = vpop.f32.mrb[7].mxu1 }
 0x106   :  { %v4006_v41 = vadd.f32 %v209_v54, %v110_v57 }
 0x108   :  { %v213_v48 = vpop.f32.mrb[8].mxu1 }
 0x109   :  { %v4008_v55 = vadd.f32 %v213_v48, %v106_v52  ;;  %v215_v60 = vpop.f32.mrb[9].mxu1 }
 0x10a   :  { %v4010_v61 = vadd.f32 %v215_v60, %v110_v57  ;;  %v3224_v44 = vpop.eup %3223 }
 0x10b   :  { %v3226_v24 = vpop.eup %3225  ;;  %v606_v27 = vadd.f32 1.0, %v3224_v44  ;;  %v4090_v44 = vpack.c.bf16 %v880_v39, %v876_v17 }
 0x10c   :  { %v219_v58 = vpop.f32.mrb[10].mxu1  ;;  %v600_v30 = vadd.f32 1.0, %v3226_v24  ;;  %v889_v24 = vld [vmem:[%s4783_s4 + $0xa8] sm:$0xff] }
 0x10d   :  { %v4012_v9 = vadd.f32 %v219_v58, %v106_v52  ;;  %v221_v2 = vpop.f32.mrb[11].mxu1  ;;  %3227 = vrcp.f32 %v606_v27  ;;  %v869_v58 = vld [vmem:[%s4783_s4 + $0x8] sm:$0xff]  ;;  %v4100_v27 = vpack.c.bf16 %v889_v24, %v885_v50  ;;  %v916_v50 = vld [vmem:[%s4783_s4 + $0x180] sm:$0xff] }
 0x10e   :  { %v4014_v4 = vadd.f32 %v221_v2, %v110_v57  ;;  %3229 = vrcp.f32 %v600_v30  ;;  %v873_v2 = vld [vmem:[%s4783_s4 + $0x28] sm:$0xff]  ;;  %v884_v30 = vld [vmem:[%s4783_s4 + $0x80] sm:$0xff] }
 0x10f   :  { %v920_v24 = vld [vmem:[%s4783_s4 + $0x1a0] sm:$0xff] }
 0x110   :  { %v225_v1 = vpop.f32.mrb[12].mxu1 }
 0x111   :  { %v4016_v13 = vadd.f32 %v225_v1, %v106_v52  ;;  %v227_v7 = vpop.f32.mrb[13].mxu1  ;;  %v4064_v1 = vpack.c.bf16 %v873_v2, %v869_v58  ;;  %v913_v58 = vld [vmem:[%s4783_s4 + $0x168] sm:$0xff]  ;;  %v908_v2 = vld [vmem:[%s4783_s4 + $0x140] sm:$0xff] }
 0x112   :  { %v4018_v10 = vadd.f32 %v227_v7, %v110_v57  ;;  %v868_v7 = vld [vmem:[%s4783_s4] sm:$0xff] }
 0x113   :  { %2743 = vmatprep.subr.bf16.mxu0 %v4064_v1 }
 0x114   :  { %v231_v8 = vpop.f32.mrb[14].mxu1 }
 0x115   :  { %v4020_v11 = vadd.f32 %v231_v8, %v106_v52  ;;  %v233_v35 = vpop.f32.mrb[15].mxu1 }
 0x116   :  { %v4022_v14 = vadd.f32 %v233_v35, %v110_v57  ;;  %v881_v35 = vld [vmem:[%s4783_s4 + $0x68] sm:$0xff] }
 0x117   :  { %v3228_v6 = vpop.eup %3227 }
 0x118   :  { %v3230_v36 = vpop.eup %3229  ;;  %v616_v25 = vmul.f32 %v3228_v6, %v382_v23  ;;  %v892_v6 = vld [vmem:[%s4783_s4 + $0xc0] sm:$0xff] }
 0x119   :  { %v896_v23 = vld [vmem:[%s4783_s4 + $0xe0] sm:$0xff] }
 0x138   :  { %v588_v32 = vpop.f32.mrb[16].mxu1 }
 0x139   :  { %v3190_v52 = vadd.f32 %v588_v32, %v4024_v28  ;;  %v590_v57 = vpop.f32.mrb[17].mxu1  ;;  %v888_v32 = vld [vmem:[%s4783_s4 + $0xa0] sm:$0xff] }
 0x13a   :  { %v3191_v33 = vadd.f32 %v590_v57, %v4026_v31  ;;  %v893_v57 = vld [vmem:[%s4783_s4 + $0xc8] sm:$0xff] }
 0x13b   :  { %3231 = vtanh.f32 %v3190_v52  ;;  %v4108_v52 = vpack.c.bf16 %v888_v32, %v884_v30  ;;  %v925_v30 = vld [vmem:[%s4783_s4 + $0x1c8] sm:$0xff] }
 0x13c   :  { %v2459_v0 = vmul.f32 -1.442695, %v3191_v33  ;;  %v897_v33 = vld [vmem:[%s4783_s4 + $0xe8] sm:$0xff] }
 0x13d   :  { %v929_v32 = vld [vmem:[%s4783_s4 + $0x1e8] sm:$0xff] }
 0x13e   :  { %3233 = vpow2.f32 %v2459_v0  ;;  %v4118_v0 = vpack.c.bf16 %v897_v33, %v893_v57  ;;  %v4186_v57 = vpack.c.bf16 %v920_v24, %v916_v50  ;;  %v4189_v33 = vpack.c.bf16 %v929_v32, %v925_v30 }
 0x145   :  { %v3232_v37 = vpop.eup %3231 }
 0x146   :  { %v617_v15 = vmul.f32 %v3232_v37, %v3230_v36  ;;  %v4126_v36 = vpack.c.bf16 %v896_v23, %v892_v6  ;;  %v901_v37 = vld [vmem:[%s4783_s4 + $0x108] sm:$0xff]  ;;  %v924_v6 = vld [vmem:[%s4783_s4 + $0x1c0] sm:$0xff] }
 0x147   :  { %v928_v23 = vld [vmem:[%s4783_s4 + $0x1e0] sm:$0xff] }
 0x148   :  { %v3234_v42 = vpop.eup %3233  ;;  %v4033_v47 = vadd.f32 %v617_v15, %v616_v25  ;;  %v905_v25 = vld [vmem:[%s4783_s4 + $0x128] sm:$0xff] }
 0x149   :  { %v613_v34 = vadd.f32 1.0, %v3234_v42  ;;  %v4136_v15 = vpack.c.bf16 %v905_v25, %v901_v37  ;;  %v900_v42 = vld [vmem:[%s4783_s4 + $0x100] sm:$0xff]  ;;  %v4198_v37 = vpack.c.bf16 %v928_v23, %v924_v6 }
 0x14a   :  { %3235 = vtanh.f32 %v4033_v47 }
 0x14b   :  { %3237 = vrcp.f32 %v613_v34  ;;  %v904_v34 = vld [vmem:[%s4783_s4 + $0x120] sm:$0xff] }
 0x154   :  { %v3236_v54 = vpop.eup %3235 }
 0x155   :  { %v3238_v48 = vpop.eup %3237 }
 0x156   :  { %v4036_v60 = vmul.f32 %v3238_v48, %v3236_v54  ;;  %v4144_v54 = vpack.c.bf16 %v904_v34, %v900_v42  ;;  %v909_v48 = vld [vmem:[%s4783_s4 + $0x148] sm:$0xff] }
 0x158   :  { %756 = vmatmul.mubr.f32.vlgmr.msra.gmra.mrb[2].mxu0 %v4036_v60  ;;  %827 = vmatmul.mubr.f32.vlgmr.msra.gmra.mrb[18].mxu1 %v4036_v60 }
 0x159   :  { %2777 = vmatpush1.bf16.msra.mxu1 %v3833_v45  ;;  %996 = vmatprep.mubr.f32.mxu0 %v3351_v3 }
 0x15a   :  { %2779 = vmatprep.subr.bf16.mxu1 %v3836_v46  ;;  %1067 = vmatprep.mubr.f32.mxu1 %v3351_v3 }
 0x15d   :  { %2781 = vmatpush1.bf16.msra.mxu1 %v3854_v51 }
 0x15e   :  { %2783 = vmatprep.subr.bf16.mxu1 %v3857_v53 }
 0x161   :  { %2785 = vmatpush1.bf16.msra.mxu1 %v3874_v56 }
 0x162   :  { %2787 = vmatprep.subr.bf16.mxu1 %v3877_v59 }
 0x165   :  { %2789 = vmatpush1.bf16.msra.mxu1 %v3894_v62 }
 0x166   :  { %2791 = vmatprep.subr.bf16.mxu1 %v3897_v63 }
 0x169   :  { %2793 = vmatpush1.bf16.msra.mxu1 %v3914_v5 }
 0x16a   :  { %2795 = vmatprep.subr.bf16.mxu1 %v3917_v22 }
 0x16d   :  { %2797 = vmatpush1.bf16.msra.mxu1 %v3934_v12 }
 0x16e   :  { %2799 = vmatprep.subr.bf16.mxu1 %v3937_v26 }
 0x171   :  { %2801 = vmatpush1.bf16.msra.mxu1 %v3954_v18 }
 0x172   :  { %2803 = vmatprep.subr.bf16.mxu1 %v3957_v19 }
 0x175   :  { %2805 = vmatpush1.bf16.msra.mxu1 %v3968_v21  ;;  %v872_v21 = vld [vmem:[%s4783_s4 + $0x20] sm:$0xff] }
 0x176   :  { %2839 = vmatprep.subr.bf16.mxu1 %v3815_v40  ;;  %v4072_v8 = vpack.c.bf16 %v872_v21, %v868_v7  ;;  %v877_v40 = vld [vmem:[%s4783_s4 + $0x48] sm:$0xff]  ;;  %v4157_v7 = vpack.c.bf16 %v913_v58, %v909_v48  ;;  %v912_v21 = vld [vmem:[%s4783_s4 + $0x160] sm:$0xff] }
 0x177   :  { %v4082_v16 = vpack.c.bf16 %v881_v35, %v877_v40  ;;  %v917_v40 = vld [vmem:[%s4783_s4 + $0x188] sm:$0xff]  ;;  %v4168_v17 = vpack.c.bf16 %v912_v21, %v908_v2 }
 0x178   :  { %2745 = vmatpush1.bf16.msra.mxu0 %v4072_v8  ;;  %v921_v35 = vld [vmem:[%s4783_s4 + $0x1a8] sm:$0xff] }
 0x179   :  { %2747 = vmatprep.subr.bf16.mxu0 %v4082_v16  ;;  %v4170_v39 = vpack.c.bf16 %v921_v35, %v917_v40 }
 0x17c   :  { %2749 = vmatpush1.bf16.msra.mxu0 %v4090_v44 }
 0x17d   :  { %2751 = vmatprep.subr.bf16.mxu0 %v4100_v27 }
 0x180   :  { %2753 = vmatpush1.bf16.msra.mxu0 %v4108_v52 }
 0x181   :  { %2755 = vmatprep.subr.bf16.mxu0 %v4118_v0 }
 0x184   :  { %2757 = vmatpush1.bf16.msra.mxu0 %v4126_v36 }
 0x185   :  { %2759 = vmatprep.subr.bf16.mxu0 %v4136_v15 }
 0x188   :  { %2761 = vmatpush1.bf16.msra.mxu0 %v4144_v54 }
 0x189   :  { %2763 = vmatprep.subr.bf16.mxu0 %v4157_v7 }
 0x18c   :  { %2765 = vmatpush1.bf16.msra.mxu0 %v4168_v17 }
 0x18d   :  { %2767 = vmatprep.subr.bf16.mxu0 %v4170_v39 }
 0x190   :  { %2769 = vmatpush1.bf16.msra.mxu0 %v4186_v57 }
 0x191   :  { %2771 = vmatprep.subr.bf16.mxu0 %v4189_v33 }
 0x194   :  { %2773 = vmatpush1.bf16.msra.mxu0 %v4198_v37 }
 0x195   :  { %2807 = vmatprep.subr.bf16.mxu0 %v4064_v1 }
 0x22b   :  { %v757_v25 = vpop.f32.mrb[2].mxu0  ;;  %v828_v42 = vpop.f32.mrb[18].mxu1 }
 0x22c   :  { %v833_v34 = vadd.f32 %v757_v25, %v3996_v38  ;;  %v759_v48 = vpop.f32.mrb[3].mxu0  ;;  %v830_v58 = vpop.f32.mrb[19].mxu1  ;;  %v3192_v24 = vadd.f32 %v828_v42, %v4024_v28 }
 0x22d   :  { %v834_v2 = vadd.f32 %v759_v48, %v3998_v20  ;;  %v3193_v35 = vadd.f32 %v830_v58, %v4026_v31 }
 0x22e   :  { %v2460_v21 = vmul.f32 -1.442695, %v833_v34 }
 0x22f   :  { %v2461_v40 = vmul.f32 -1.442695, %v834_v2  ;;  %v2462_v50 = vmul.f32 -1.442695, %v3193_v35 }
 0x230   :  { %3239 = vpow2.f32 %v2460_v21 }
 0x231   :  { %3241 = vpow2.f32 %v2461_v40 }
 0x232   :  { %3243 = vpow2.f32 %v2462_v50 }
 0x233   :  { %3245 = vtanh.f32 %v3192_v24 }
 0x23a   :  { %v3240_v30 = vpop.eup %3239 }
 0x23b   :  { %v3242_v32 = vpop.eup %3241  ;;  %v840_v6 = vadd.f32 1.0, %v3240_v30 }
 0x23c   :  { %v846_v23 = vadd.f32 1.0, %v3242_v32  ;;  %v3244_v38 = vpop.eup %3243 }
 0x23d   :  { %3247 = vrcp.f32 %v840_v6  ;;  %v3246_v25 = vpop.eup %3245  ;;  %v853_v2 = vadd.f32 1.0, %v3244_v38 }
 0x23e   :  { %3249 = vrcp.f32 %v846_v23 }
 0x23f   :  { %3251 = vrcp.f32 %v853_v2 }
 0x247   :  { %v3248_v20 = vpop.eup %3247 }
 0x248   :  { %v3250_v34 = vpop.eup %3249  ;;  %v857_v48 = vmul.f32 %v3248_v20, %v3246_v25 }
 0x249   :  { %v856_v21 = vmul.f32 %v3250_v34, %v4033_v47  ;;  %v3252_v42 = vpop.eup %3251 }
 0x24b   :  { %v4208_v58 = vadd.f32 %v857_v48, %v856_v21  ;;  %v1353_v21 = vld [vmem:[%s4783_s4 + $0x18] sm:$0xff] }
 0x24d   :  { %3253 = vtanh.f32 %v4208_v58 }
 0x257   :  { %v3254_v40 = vpop.eup %3253 }
 0x258   :  { %v4211_v35 = vmul.f32 %v3254_v40, %v3252_v42  ;;  %v1352_v40 = vld [vmem:[%s4783_s4 + $0x10] sm:$0xff] }
 0x25a   :  { %997 = vmatmul.mubr.f32.vlgmr.msra.gmra.mrb[4].mxu0 %v4211_v35  ;;  %1068 = vmatmul.mubr.f32.vlgmr.msra.gmra.mrb[20].mxu1 %v4211_v35 }
 0x25b   :  { %2809 = vmatpush1.bf16.msra.mxu0 %v4072_v8  ;;  %2841 = vmatpush1.bf16.msra.mxu1 %v3833_v45  ;;  %v1167_v45 = vld [vmem:[%s4783_s4 + $0x1d0] sm:$0xff] }
 0x25c   :  { %2811 = vmatprep.subr.bf16.mxu0 %v4082_v16  ;;  %2843 = vmatprep.subr.bf16.mxu1 %v3836_v46  ;;  %v1171_v46 = vld [vmem:[%s4783_s4 + $0x1f0] sm:$0xff] }
 0x25d   :  { %1237 = vmatprep.mubr.f32.mxu0 %v3351_v3  ;;  %1308 = vmatprep.mubr.f32.mxu1 %v3351_v3 }
 0x25f   :  { %2813 = vmatpush1.bf16.msra.mxu0 %v4090_v44  ;;  %2845 = vmatpush1.bf16.msra.mxu1 %v3854_v51  ;;  %v4253_v51 = vpack.c.bf16 %v1171_v46, %v1167_v45  ;;  %v1356_v45 = vld [vmem:[%s4783_s4 + $0x30] sm:$0xff] }
 0x260   :  { %2815 = vmatprep.subr.bf16.mxu0 %v4100_v27  ;;  %2847 = vmatprep.subr.bf16.mxu1 %v3857_v53  ;;  %v4300_v46 = vpack.c.bf16 %v1356_v45, %v1352_v40  ;;  %v1396_v45 = vld [vmem:[%s4783_s4 + $0x170] sm:$0xff] }
 0x263   :  { %2817 = vmatpush1.bf16.msra.mxu0 %v4108_v52  ;;  %2849 = vmatpush1.bf16.msra.mxu1 %v3874_v56 }
 0x264   :  { %2819 = vmatprep.subr.bf16.mxu0 %v4118_v0  ;;  %2851 = vmatprep.subr.bf16.mxu1 %v3877_v59 }
 0x267   :  { %2821 = vmatpush1.bf16.msra.mxu0 %v4126_v36  ;;  %2853 = vmatpush1.bf16.msra.mxu1 %v3894_v62 }
 0x268   :  { %2823 = vmatprep.subr.bf16.mxu0 %v4136_v15  ;;  %2855 = vmatprep.subr.bf16.mxu1 %v3897_v63 }
 0x26b   :  { %2825 = vmatpush1.bf16.msra.mxu0 %v4144_v54  ;;  %2857 = vmatpush1.bf16.msra.mxu1 %v3914_v5 }
 0x26c   :  { %2827 = vmatprep.subr.bf16.mxu0 %v4157_v7  ;;  %2859 = vmatprep.subr.bf16.mxu1 %v3917_v22 }
 0x26f   :  { %2829 = vmatpush1.bf16.msra.mxu0 %v4168_v17  ;;  %2861 = vmatpush1.bf16.msra.mxu1 %v3934_v12 }
 0x270   :  { %2831 = vmatprep.subr.bf16.mxu0 %v4170_v39  ;;  %2863 = vmatprep.subr.bf16.mxu1 %v3937_v26 }
 0x273   :  { %2833 = vmatpush1.bf16.msra.mxu0 %v4186_v57  ;;  %2865 = vmatpush1.bf16.msra.mxu1 %v3954_v18 }
 0x274   :  { %2835 = vmatprep.subr.bf16.mxu0 %v4189_v33  ;;  %2867 = vmatprep.subr.bf16.mxu1 %v3957_v19 }
 0x277   :  { %2837 = vmatpush1.bf16.msra.mxu0 %v4198_v37  ;;  %2869 = vmatpush1.bf16.msra.mxu1 %v4253_v51 }
 0x278   :  { %2871 = vmatprep.subr.bf16.mxu0 %v4064_v1 }
 0x32d   :  { %v998_v53 = vpop.f32.mrb[4].mxu0  ;;  %v1069_v56 = vpop.f32.mrb[20].mxu1 }
 0x32e   :  { %v1074_v59 = vadd.f32 %v998_v53, %v4000_v43  ;;  %v1000_v62 = vpop.f32.mrb[5].mxu0  ;;  %v1071_v63 = vpop.f32.mrb[21].mxu1  ;;  %v3194_v19 = vadd.f32 %v1069_v56, %v4024_v28  ;;  %v1365_v53 = vld [vmem:[%s4783_s4 + $0x78] sm:$0xff] }
 0x32f   :  { %v1075_v5 = vadd.f32 %v1000_v62, %v4002_v29  ;;  %v3195_v26 = vadd.f32 %v1071_v63, %v4026_v31  ;;  %v1364_v62 = vld [vmem:[%s4783_s4 + $0x70] sm:$0xff] }
 0x330   :  { %v2463_v22 = vmul.f32 -1.442695, %v1074_v59  ;;  %v1360_v59 = vld [vmem:[%s4783_s4 + $0x50] sm:$0xff] }
 0x331   :  { %v2464_v12 = vmul.f32 -1.442695, %v1075_v5  ;;  %v2465_v18 = vmul.f32 -1.442695, %v3195_v26  ;;  %v4318_v63 = vpack.c.bf16 %v1364_v62, %v1360_v59  ;;  %v1369_v5 = vld [vmem:[%s4783_s4 + $0x98] sm:$0xff]  ;;  %v1368_v26 = vld [vmem:[%s4783_s4 + $0x90] sm:$0xff] }
 0x332   :  { %3255 = vpow2.f32 %v2463_v22  ;;  %v1373_v22 = vld [vmem:[%s4783_s4 + $0xb8] sm:$0xff] }
 0x333   :  { %3257 = vpow2.f32 %v2464_v12  ;;  %v4328_v12 = vpack.c.bf16 %v1373_v22, %v1369_v5  ;;  %v1400_v5 = vld [vmem:[%s4783_s4 + $0x190] sm:$0xff] }
 0x334   :  { %3259 = vpow2.f32 %v2465_v18  ;;  %v1372_v18 = vld [vmem:[%s4783_s4 + $0xb0] sm:$0xff] }
 0x335   :  { %3261 = vtanh.f32 %v3194_v19  ;;  %v4336_v19 = vpack.c.bf16 %v1372_v18, %v1368_v26  ;;  %v1404_v22 = vld [vmem:[%s4783_s4 + $0x1b0] sm:$0xff]  ;;  %v1409_v26 = vld [vmem:[%s4783_s4 + $0x1d8] sm:$0xff] }
 0x336   :  { %v1413_v18 = vld [vmem:[%s4783_s4 + $0x1f8] sm:$0xff] }
 0x33c   :  { %v3256_v47 = vpop.eup %3255 }
 0x33d   :  { %v3258_v50 = vpop.eup %3257  ;;  %v1081_v24 = vadd.f32 1.0, %v3256_v47  ;;  %v1377_v47 = vld [vmem:[%s4783_s4 + $0xd8] sm:$0xff] }
 0x33e   :  { %v1087_v30 = vadd.f32 1.0, %v3258_v50  ;;  %v3260_v43 = vpop.eup %3259  ;;  %v1381_v50 = vld [vmem:[%s4783_s4 + $0xf8] sm:$0xff] }
 0x33f   :  { %3263 = vrcp.f32 %v1081_v24  ;;  %v3262_v32 = vpop.eup %3261  ;;  %v1094_v38 = vadd.f32 1.0, %v3260_v43  ;;  %v4346_v24 = vpack.c.bf16 %v1381_v50, %v1377_v47  ;;  %v1380_v43 = vld [vmem:[%s4783_s4 + $0xf0] sm:$0xff]  ;;  %v4414_v47 = vpack.c.bf16 %v1404_v22, %v1400_v5 }
 0x340   :  { %3265 = vrcp.f32 %v1087_v30  ;;  %v1376_v30 = vld [vmem:[%s4783_s4 + $0xd0] sm:$0xff]  ;;  %v4417_v50 = vpack.c.bf16 %v1413_v18, %v1409_v26 }
 0x341   :  { %3267 = vrcp.f32 %v1094_v38  ;;  %v1384_v38 = vld [vmem:[%s4783_s4 + $0x110] sm:$0xff] }
 0x349   :  { %v3264_v29 = vpop.eup %3263 }
 0x34a   :  { %v3266_v6 = vpop.eup %3265  ;;  %v1098_v23 = vmul.f32 %v3264_v29, %v3262_v32  ;;  %v4354_v32 = vpack.c.bf16 %v1380_v43, %v1376_v30  ;;  %v1385_v29 = vld [vmem:[%s4783_s4 + $0x118] sm:$0xff] }
 0x34b   :  { %v1097_v25 = vmul.f32 %v3266_v6, %v4208_v58  ;;  %v3268_v34 = vpop.eup %3267  ;;  %v1357_v58 = vld [vmem:[%s4783_s4 + $0x38] sm:$0xff] }
 0x34c   :  { %v4292_v42 = vpack.c.bf16 %v1357_v58, %v1353_v21  ;;  %v1389_v6 = vld [vmem:[%s4783_s4 + $0x138] sm:$0xff]  ;;  %v1392_v58 = vld [vmem:[%s4783_s4 + $0x150] sm:$0xff] }
 0x34d   :  { %v4261_v20 = vadd.f32 %v1098_v23, %v1097_v25  ;;  %v4364_v23 = vpack.c.bf16 %v1389_v6, %v1385_v29  ;;  %v1388_v25 = vld [vmem:[%s4783_s4 + $0x130] sm:$0xff]  ;;  %v1397_v21 = vld [vmem:[%s4783_s4 + $0x178] sm:$0xff]  ;;  %v4396_v59 = vpack.c.bf16 %v1396_v45, %v1392_v58 }
 0x34e   :  { %2903 = vmatprep.subr.bf16.mxu1 %v4292_v42 }
 0x34f   :  { %3269 = vtanh.f32 %v4261_v20 }
 0x359   :  { %v3270_v48 = vpop.eup %3269 }
 0x35a   :  { %v4264_v2 = vmul.f32 %v3270_v48, %v3268_v34  ;;  %v4372_v34 = vpack.c.bf16 %v1388_v25, %v1384_v38  ;;  %v1393_v48 = vld [vmem:[%s4783_s4 + $0x158] sm:$0xff] }
 0x35b   :  { %v4385_v40 = vpack.c.bf16 %v1397_v21, %v1393_v48 }
 0x35c   :  { %1238 = vmatmul.mubr.f32.vlgmr.msra.gmra.mrb[6].mxu0 %v4264_v2  ;;  %1309 = vmatmul.mubr.f32.vlgmr.msra.gmra.mrb[22].mxu1 %v4264_v2 }
 0x35d   :  { %2873 = vmatpush1.bf16.msra.mxu0 %v4072_v8  ;;  %1478 = vmatprep.mubr.f32.mxu0 %v3351_v3 }
 0x35e   :  { %2875 = vmatprep.subr.bf16.mxu0 %v4082_v16  ;;  %1549 = vmatprep.mubr.f32.mxu1 %v3351_v3 }
 0x35f   :  { %2905 = vmatpush1.bf16.msra.mxu1 %v4300_v46 }
 0x361   :  { %2877 = vmatpush1.bf16.msra.mxu0 %v4090_v44 }
 0x362   :  { %2879 = vmatprep.subr.bf16.mxu0 %v4100_v27 }
 0x365   :  { %2881 = vmatpush1.bf16.msra.mxu0 %v4108_v52 }
 0x366   :  { %2883 = vmatprep.subr.bf16.mxu0 %v4118_v0 }
 0x369   :  { %2885 = vmatpush1.bf16.msra.mxu0 %v4126_v36 }
 0x36a   :  { %2887 = vmatprep.subr.bf16.mxu0 %v4136_v15 }
 0x36d   :  { %2889 = vmatpush1.bf16.msra.mxu0 %v4144_v54 }
 0x36e   :  { %2891 = vmatprep.subr.bf16.mxu0 %v4157_v7 }
 0x371   :  { %2893 = vmatpush1.bf16.msra.mxu0 %v4168_v17 }
 0x372   :  { %2895 = vmatprep.subr.bf16.mxu0 %v4170_v39 }
 0x375   :  { %2897 = vmatpush1.bf16.msra.mxu0 %v4186_v57 }
 0x376   :  { %2899 = vmatprep.subr.bf16.mxu0 %v4189_v33 }
 0x379   :  { %2901 = vmatpush1.bf16.msra.mxu0 %v4198_v37 }
 0x37a   :  { %2935 = vmatprep.subr.bf16.mxu0 %v4064_v1  ;;  %v1361_v1 = vld [vmem:[%s4783_s4 + $0x58] sm:$0xff] }
 0x37b   :  { %v4310_v56 = vpack.c.bf16 %v1365_v53, %v1361_v1  ;;  %v1401_v1 = vld [vmem:[%s4783_s4 + $0x198] sm:$0xff] }
 0x37c   :  { %v1405_v53 = vld [vmem:[%s4783_s4 + $0x1b8] sm:$0xff] }
 0x37d   :  { %2907 = vmatprep.subr.bf16.mxu1 %v4310_v56  ;;  %v4398_v62 = vpack.c.bf16 %v1405_v53, %v1401_v1 }
 0x37e   :  { %2909 = vmatpush1.bf16.msra.mxu1 %v4318_v63 }
 0x37f   :  { %2911 = vmatprep.subr.bf16.mxu1 %v4328_v12 }
 0x382   :  { %2913 = vmatpush1.bf16.msra.mxu1 %v4336_v19 }
 0x383   :  { %2915 = vmatprep.subr.bf16.mxu1 %v4346_v24 }
 0x386   :  { %2917 = vmatpush1.bf16.msra.mxu1 %v4354_v32 }
 0x387   :  { %2919 = vmatprep.subr.bf16.mxu1 %v4364_v23 }
 0x38a   :  { %2921 = vmatpush1.bf16.msra.mxu1 %v4372_v34 }
 0x38b   :  { %2923 = vmatprep.subr.bf16.mxu1 %v4385_v40 }
 0x38e   :  { %2925 = vmatpush1.bf16.msra.mxu1 %v4396_v59 }
 0x38f   :  { %2927 = vmatprep.subr.bf16.mxu1 %v4398_v62 }
 0x392   :  { %2929 = vmatpush1.bf16.msra.mxu1 %v4414_v47 }
 0x393   :  { %2931 = vmatprep.subr.bf16.mxu1 %v4417_v50 }
 0x396   :  { %2933 = vmatpush1.bf16.msra.mxu1 %v4253_v51 }
 0x397   :  { %2967 = vmatprep.subr.bf16.mxu1 %v4292_v42 }
 0x42f   :  { %v1239_v30 = vpop.f32.mrb[6].mxu0  ;;  %v1310_v43 = vpop.f32.mrb[22].mxu1 }
 0x430   :  { %v1315_v29 = vadd.f32 %v1239_v30, %v4004_v49  ;;  %v1241_v6 = vpop.f32.mrb[7].mxu0  ;;  %v1312_v38 = vpop.f32.mrb[23].mxu1  ;;  %v3196_v1 = vadd.f32 %v1310_v43, %v4024_v28 }
 0x431   :  { %v1316_v25 = vadd.f32 %v1241_v6, %v4006_v41  ;;  %v3197_v58 = vadd.f32 %v1312_v38, %v4026_v31 }
 0x432   :  { %v2466_v48 = vmul.f32 -1.442695, %v1315_v29 }
 0x433   :  { %v2467_v21 = vmul.f32 -1.442695, %v1316_v25  ;;  %v2468_v45 = vmul.f32 -1.442695, %v3197_v58 }
 0x434   :  { %3271 = vpow2.f32 %v2466_v48 }
 0x435   :  { %3273 = vpow2.f32 %v2467_v21 }
 0x436   :  { %3275 = vpow2.f32 %v2468_v45 }
 0x437   :  { %3277 = vtanh.f32 %v3196_v1 }
 0x43e   :  { %v3272_v53 = vpop.eup %3271 }
 0x43f   :  { %v3274_v5 = vpop.eup %3273  ;;  %v1322_v22 = vadd.f32 1.0, %v3272_v53 }
 0x440   :  { %v1328_v26 = vadd.f32 1.0, %v3274_v5  ;;  %v3276_v49 = vpop.eup %3275 }
 0x441   :  { %3279 = vrcp.f32 %v1322_v22  ;;  %v3278_v18 = vpop.eup %3277  ;;  %v1335_v6 = vadd.f32 1.0, %v3276_v49 }
 0x442   :  { %3281 = vrcp.f32 %v1328_v26 }
 0x443   :  { %3283 = vrcp.f32 %v1335_v6  ;;  %v1836_v6 = vld [vmem:[%s4783_s4 + $0x20] sm:$0xff] }
 0x44b   :  { %v3280_v41 = vpop.eup %3279 }
 0x44c   :  { %v3282_v30 = vpop.eup %3281  ;;  %v1339_v29 = vmul.f32 %v3280_v41, %v3278_v18  ;;  %v1833_v18 = vld [vmem:[%s4783_s4 + $0x8] sm:$0xff] }
 0x44d   :  { %v1338_v25 = vmul.f32 %v3282_v30, %v4261_v20  ;;  %v3284_v43 = vpop.eup %3283  ;;  %v1837_v41 = vld [vmem:[%s4783_s4 + $0x28] sm:$0xff] }
 0x44e   :  { %v2998_v30 = vpack.c.bf16 %v1837_v41, %v1833_v18  ;;  %v1881_v18 = vld [vmem:[%s4783_s4 + $0x188] sm:$0xff] }
 0x44f   :  { %v4428_v38 = vadd.f32 %v1339_v29, %v1338_v25  ;;  %v1832_v29 = vld [vmem:[%s4783_s4] sm:$0xff]  ;;  %v1845_v25 = vld [vmem:[%s4783_s4 + $0x68] sm:$0xff] }
 0x450   :  { %v1885_v41 = vld [vmem:[%s4783_s4 + $0x1a8] sm:$0xff] }
 0x451   :  { %3285 = vtanh.f32 %v4428_v38 }
 0x45b   :  { %v3286_v48 = vpop.eup %3285 }
 0x45c   :  { %v4431_v21 = vmul.f32 %v3286_v48, %v3284_v43  ;;  %v1840_v43 = vld [vmem:[%s4783_s4 + $0x40] sm:$0xff] }
 0x45d   :  { %v1844_v48 = vld [vmem:[%s4783_s4 + $0x60] sm:$0xff] }
 0x45e   :  { %1479 = vmatmul.mubr.f32.vlgmr.msra.gmra.mrb[8].mxu0 %v4431_v21  ;;  %1550 = vmatmul.mubr.f32.vlgmr.msra.gmra.mrb[24].mxu1 %v4431_v21 }
 0x45f   :  { %2937 = vmatpush1.bf16.msra.mxu0 %v4072_v8  ;;  %2969 = vmatpush1.bf16.msra.mxu1 %v4300_v46 }
 0x460   :  { %2939 = vmatprep.subr.bf16.mxu0 %v4082_v16  ;;  %2971 = vmatprep.subr.bf16.mxu1 %v4310_v56 }
 0x461   :  { %1719 = vmatprep.mubr.f32.mxu0 %v3351_v3  ;;  %1790 = vmatprep.mubr.f32.mxu1 %v3351_v3 }
 0x463   :  { %2941 = vmatpush1.bf16.msra.mxu0 %v4090_v44  ;;  %2973 = vmatpush1.bf16.msra.mxu1 %v4318_v63 }
 0x464   :  { %2943 = vmatprep.subr.bf16.mxu0 %v4100_v27  ;;  %2975 = vmatprep.subr.bf16.mxu1 %v4328_v12 }
 0x467   :  { %2945 = vmatpush1.bf16.msra.mxu0 %v4108_v52  ;;  %2977 = vmatpush1.bf16.msra.mxu1 %v4336_v19 }
 0x468   :  { %2947 = vmatprep.subr.bf16.mxu0 %v4118_v0  ;;  %2979 = vmatprep.subr.bf16.mxu1 %v4346_v24 }
 0x46b   :  { %2949 = vmatpush1.bf16.msra.mxu0 %v4126_v36  ;;  %2981 = vmatpush1.bf16.msra.mxu1 %v4354_v32 }
 0x46c   :  { %2951 = vmatprep.subr.bf16.mxu0 %v4136_v15  ;;  %2983 = vmatprep.subr.bf16.mxu1 %v4364_v23 }
 0x46f   :  { %2953 = vmatpush1.bf16.msra.mxu0 %v4144_v54  ;;  %2985 = vmatpush1.bf16.msra.mxu1 %v4372_v34 }
 0x470   :  { %2955 = vmatprep.subr.bf16.mxu0 %v4157_v7  ;;  %2987 = vmatprep.subr.bf16.mxu1 %v4385_v40 }
 0x473   :  { %2957 = vmatpush1.bf16.msra.mxu0 %v4168_v17  ;;  %2989 = vmatpush1.bf16.msra.mxu1 %v4396_v59 }
 0x474   :  { %2959 = vmatprep.subr.bf16.mxu0 %v4170_v39  ;;  %2991 = vmatprep.subr.bf16.mxu1 %v4398_v62 }
 0x477   :  { %2961 = vmatpush1.bf16.msra.mxu0 %v4186_v57  ;;  %2993 = vmatpush1.bf16.msra.mxu1 %v4414_v47 }
 0x478   :  { %2963 = vmatprep.subr.bf16.mxu0 %v4189_v33  ;;  %2995 = vmatprep.subr.bf16.mxu1 %v4417_v50 }
 0x47b   :  { %2965 = vmatpush1.bf16.msra.mxu0 %v4198_v37  ;;  %2997 = vmatpush1.bf16.msra.mxu1 %v4253_v51 }
 0x47c   :  { %3031 = vmatprep.subr.bf16.mxu1 %v4292_v42  ;;  %2999 = vmatprep.subr.bf16.mxu0 %v2998_v30 }
 0x531   :  { %v1480_v8 = vpop.f32.mrb[8].mxu0  ;;  %v1551_v16 = vpop.f32.mrb[24].mxu1 }
 0x532   :  { %v1556_v44 = vadd.f32 %v1480_v8, %v4008_v55  ;;  %v1482_v27 = vpop.f32.mrb[9].mxu0  ;;  %v1553_v52 = vpop.f32.mrb[25].mxu1  ;;  %v3198_v17 = vadd.f32 %v1551_v16, %v4024_v28  ;;  %v4527_v8 = vpack.c.bf16 %v1844_v48, %v1840_v43  ;;  %v1849_v16 = vld [vmem:[%s4783_s4 + $0x88] sm:$0xff] }
 0x533   :  { %v1557_v0 = vadd.f32 %v1482_v27, %v4010_v61  ;;  %v3199_v54 = vadd.f32 %v1553_v52, %v4026_v31  ;;  %v1848_v52 = vld [vmem:[%s4783_s4 + $0x80] sm:$0xff]  ;;  %v1889_v43 = vld [vmem:[%s4783_s4 + $0x1c8] sm:$0xff] }
 0x534   :  { %v2469_v36 = vmul.f32 -1.442695, %v1556_v44  ;;  %v1853_v44 = vld [vmem:[%s4783_s4 + $0xa8] sm:$0xff] }
 0x535   :  { %v2470_v15 = vmul.f32 -1.442695, %v1557_v0  ;;  %v2471_v7 = vmul.f32 -1.442695, %v3199_v54  ;;  %v4537_v27 = vpack.c.bf16 %v1853_v44, %v1849_v16  ;;  %v1852_v0 = vld [vmem:[%s4783_s4 + $0xa0] sm:$0xff]  ;;  %v1861_v54 = vld [vmem:[%s4783_s4 + $0xe8] sm:$0xff] }
 0x536   :  { %3287 = vpow2.f32 %v2469_v36  ;;  %v4545_v36 = vpack.c.bf16 %v1852_v0, %v1848_v52  ;;  %v1893_v48 = vld [vmem:[%s4783_s4 + $0x1e8] sm:$0xff]  ;;  %v1888_v52 = vld [vmem:[%s4783_s4 + $0x1c0] sm:$0xff] }
 0x537   :  { %3289 = vpow2.f32 %v2470_v15  ;;  %v1857_v15 = vld [vmem:[%s4783_s4 + $0xc8] sm:$0xff]  ;;  %v4626_v44 = vpack.c.bf16 %v1893_v48, %v1889_v43  ;;  %v1892_v0 = vld [vmem:[%s4783_s4 + $0x1e0] sm:$0xff] }
 0x538   :  { %3291 = vpow2.f32 %v2471_v7  ;;  %v4555_v7 = vpack.c.bf16 %v1861_v54, %v1857_v15  ;;  %v4635_v15 = vpack.c.bf16 %v1892_v0, %v1888_v52 }
 0x539   :  { %3293 = vtanh.f32 %v3198_v17  ;;  %v1856_v17 = vld [vmem:[%s4783_s4 + $0xc0] sm:$0xff] }
 0x540   :  { %v3288_v39 = vpop.eup %3287 }
 0x541   :  { %v3290_v57 = vpop.eup %3289  ;;  %v1563_v33 = vadd.f32 1.0, %v3288_v39  ;;  %v1860_v39 = vld [vmem:[%s4783_s4 + $0xe0] sm:$0xff] }
 0x542   :  { %v1569_v37 = vadd.f32 1.0, %v3290_v57  ;;  %v3292_v55 = vpop.eup %3291  ;;  %v4563_v57 = vpack.c.bf16 %v1860_v39, %v1856_v17 }
 0x543   :  { %3295 = vrcp.f32 %v1563_v33  ;;  %v3294_v20 = vpop.eup %3293  ;;  %v1576_v1 = vadd.f32 1.0, %v3292_v55  ;;  %v1865_v33 = vld [vmem:[%s4783_s4 + $0x108] sm:$0xff] }
 0x544   :  { %3297 = vrcp.f32 %v1569_v37  ;;  %v1869_v37 = vld [vmem:[%s4783_s4 + $0x128] sm:$0xff] }
 0x545   :  { %3299 = vrcp.f32 %v1576_v1  ;;  %v4573_v55 = vpack.c.bf16 %v1869_v37, %v1865_v33  ;;  %v1877_v1 = vld [vmem:[%s4783_s4 + $0x168] sm:$0xff] }
 0x54d   :  { %v3296_v61 = vpop.eup %3295 }
 0x54e   :  { %v3298_v58 = vpop.eup %3297  ;;  %v1580_v45 = vmul.f32 %v3296_v61, %v3294_v20  ;;  %v1864_v20 = vld [vmem:[%s4783_s4 + $0x100] sm:$0xff] }
 0x54f   :  { %v1579_v53 = vmul.f32 %v3298_v58, %v4428_v38  ;;  %v3300_v22 = vpop.eup %3299  ;;  %v1868_v61 = vld [vmem:[%s4783_s4 + $0x120] sm:$0xff] }
 0x550   :  { %v4581_v58 = vpack.c.bf16 %v1868_v61, %v1864_v20 }
 0x551   :  { %v4473_v5 = vadd.f32 %v1580_v45, %v1579_v53  ;;  %v1873_v45 = vld [vmem:[%s4783_s4 + $0x148] sm:$0xff]  ;;  %v1872_v53 = vld [vmem:[%s4783_s4 + $0x140] sm:$0xff] }
 0x553   :  { %3301 = vtanh.f32 %v4473_v5 }
 0x55d   :  { %v3302_v26 = vpop.eup %3301 }
 0x55e   :  { %v4476_v49 = vmul.f32 %v3302_v26, %v3300_v22  ;;  %v4594_v22 = vpack.c.bf16 %v1877_v1, %v1873_v45  ;;  %v1876_v26 = vld [vmem:[%s4783_s4 + $0x160] sm:$0xff] }
 0x560   :  { %1720 = vmatmul.mubr.f32.vlgmr.msra.gmra.mrb[10].mxu0 %v4476_v49  ;;  %1791 = vmatmul.mubr.f32.vlgmr.msra.gmra.mrb[26].mxu1 %v4476_v49 }
 0x561   :  { %3033 = vmatpush1.bf16.msra.mxu1 %v4300_v46  ;;  %1960 = vmatprep.mubr.f32.mxu0 %v3351_v3 }
 0x562   :  { %3035 = vmatprep.subr.bf16.mxu1 %v4310_v56  ;;  %2031 = vmatprep.mubr.f32.mxu1 %v3351_v3 }
 0x565   :  { %3037 = vmatpush1.bf16.msra.mxu1 %v4318_v63 }
 0x566   :  { %3039 = vmatprep.subr.bf16.mxu1 %v4328_v12 }
 0x569   :  { %3041 = vmatpush1.bf16.msra.mxu1 %v4336_v19 }
 0x56a   :  { %3043 = vmatprep.subr.bf16.mxu1 %v4346_v24 }
 0x56d   :  { %3045 = vmatpush1.bf16.msra.mxu1 %v4354_v32 }
 0x56e   :  { %3047 = vmatprep.subr.bf16.mxu1 %v4364_v23 }
 0x571   :  { %3049 = vmatpush1.bf16.msra.mxu1 %v4372_v34 }
 0x572   :  { %3051 = vmatprep.subr.bf16.mxu1 %v4385_v40 }
 0x575   :  { %3053 = vmatpush1.bf16.msra.mxu1 %v4396_v59 }
 0x576   :  { %3055 = vmatprep.subr.bf16.mxu1 %v4398_v62 }
 0x579   :  { %3057 = vmatpush1.bf16.msra.mxu1 %v4414_v47 }
 0x57a   :  { %3059 = vmatprep.subr.bf16.mxu1 %v4417_v50 }
 0x57d   :  { %3061 = vmatpush1.bf16.msra.mxu1 %v4253_v51  ;;  %v4510_v51 = vpack.c.bf16 %v1836_v6, %v1832_v29  ;;  %v4605_v29 = vpack.c.bf16 %v1876_v26, %v1872_v53  ;;  %v4607_v6 = vpack.c.bf16 %v1885_v41, %v1881_v18 }
 0x57e   :  { %3095 = vmatprep.subr.bf16.mxu1 %v4292_v42  ;;  %v1841_v42 = vld [vmem:[%s4783_s4 + $0x48] sm:$0xff] }
 0x57f   :  { %3001 = vmatpush1.bf16.msra.mxu0 %v4510_v51  ;;  %v4519_v38 = vpack.c.bf16 %v1845_v25, %v1841_v42  ;;  %v1880_v42 = vld [vmem:[%s4783_s4 + $0x180] sm:$0xff] }
 0x580   :  { %v1884_v25 = vld [vmem:[%s4783_s4 + $0x1a0] sm:$0xff] }
 0x581   :  { %3003 = vmatprep.subr.bf16.mxu0 %v4519_v38  ;;  %v4623_v16 = vpack.c.bf16 %v1884_v25, %v1880_v42 }
 0x583   :  { %3005 = vmatpush1.bf16.msra.mxu0 %v4527_v8 }
 0x584   :  { %3007 = vmatprep.subr.bf16.mxu0 %v4537_v27 }
 0x587   :  { %3009 = vmatpush1.bf16.msra.mxu0 %v4545_v36 }
 0x588   :  { %3011 = vmatprep.subr.bf16.mxu0 %v4555_v7 }
 0x58b   :  { %3013 = vmatpush1.bf16.msra.mxu0 %v4563_v57 }
 0x58c   :  { %3015 = vmatprep.subr.bf16.mxu0 %v4573_v55 }
 0x58f   :  { %3017 = vmatpush1.bf16.msra.mxu0 %v4581_v58 }
 0x590   :  { %3019 = vmatprep.subr.bf16.mxu0 %v4594_v22 }
 0x593   :  { %3021 = vmatpush1.bf16.msra.mxu0 %v4605_v29 }
 0x594   :  { %3023 = vmatprep.subr.bf16.mxu0 %v4607_v6 }
 0x597   :  { %3025 = vmatpush1.bf16.msra.mxu0 %v4623_v16 }
 0x598   :  { %3027 = vmatprep.subr.bf16.mxu0 %v4626_v44 }
 0x59b   :  { %3029 = vmatpush1.bf16.msra.mxu0 %v4635_v15 }
 0x59c   :  { %3063 = vmatprep.subr.bf16.mxu0 %v2998_v30 }
 0x633   :  { %v1721_v54 = vpop.f32.mrb[10].mxu0  ;;  %v1792_v17 = vpop.f32.mrb[26].mxu1 }
 0x634   :  { %v1797_v39 = vadd.f32 %v1721_v54, %v4012_v9  ;;  %v1723_v33 = vpop.f32.mrb[11].mxu0  ;;  %v1794_v37 = vpop.f32.mrb[27].mxu1  ;;  %v3200_v26 = vadd.f32 %v1792_v17, %v4024_v28 }
 0x635   :  { %v1798_v20 = vadd.f32 %v1723_v33, %v4014_v4  ;;  %v3201_v1 = vadd.f32 %v1794_v37, %v4026_v31 }
 0x636   :  { %v2472_v61 = vmul.f32 -1.442695, %v1797_v39 }
 0x637   :  { %v2473_v45 = vmul.f32 -1.442695, %v1798_v20  ;;  %v2474_v53 = vmul.f32 -1.442695, %v3201_v1 }
 0x638   :  { %3303 = vpow2.f32 %v2472_v61  ;;  %v2321_v61 = vld [vmem:[%s4788_s6 + $0x20] sm:$0xff] }
 0x639   :  { %3305 = vpow2.f32 %v2473_v45  ;;  %v2322_v45 = vld [vmem:[%s4788_s6 + $0x28] sm:$0xff] }
 0x63a   :  { %3307 = vpow2.f32 %v2474_v53  ;;  %v3134_v1 = vpack.c.bf16 %v2322_v45, %v2321_v61  ;;  %v2323_v53 = vld [vmem:[%s4788_s6 + $0x30] sm:$0xff] }
 0x63b   :  { %3309 = vtanh.f32 %v3200_v26  ;;  %v2324_v26 = vld [vmem:[%s4788_s6 + $0x38] sm:$0xff] }
 0x642   :  { %v3304_v18 = vpop.eup %3303 }
 0x643   :  { %v3306_v41 = vpop.eup %3305  ;;  %v1804_v30 = vadd.f32 1.0, %v3304_v18  ;;  %v3138_v18 = vpack.c.bf16 %v2324_v26, %v2323_v53 }
 0x644   :  { %v1810_v42 = vadd.f32 1.0, %v3306_v41  ;;  %v3308_v9 = vpop.eup %3307  ;;  %v2325_v41 = vld [vmem:[%s4788_s6 + $0x40] sm:$0xff] }
 0x645   :  { %3311 = vrcp.f32 %v1804_v30  ;;  %v3310_v25 = vpop.eup %3309  ;;  %v1817_v52 = vadd.f32 1.0, %v3308_v9  ;;  %v2328_v9 = vld [vmem:[%s4788_s6 + $0x58] sm:$0xff] }
 0x646   :  { %3313 = vrcp.f32 %v1810_v42  ;;  %v2327_v42 = vld [vmem:[%s4788_s6 + $0x50] sm:$0xff] }
 0x647   :  { %3315 = vrcp.f32 %v1817_v52  ;;  %v2331_v52 = vld [vmem:[%s4788_s6 + $0x70] sm:$0xff] }
 0x64f   :  { %v3312_v4 = vpop.eup %3311 }
 0x650   :  { %v3314_v43 = vpop.eup %3313  ;;  %v1821_v48 = vmul.f32 %v3312_v4, %v3310_v25  ;;  %v3146_v25 = vpack.c.bf16 %v2328_v9, %v2327_v42  ;;  %v2329_v4 = vld [vmem:[%s4788_s6 + $0x60] sm:$0xff] }
 0x651   :  { %v1820_v0 = vmul.f32 %v3314_v43, %v4473_v5  ;;  %v3316_v17 = vpop.eup %3315  ;;  %v2330_v43 = vld [vmem:[%s4788_s6 + $0x68] sm:$0xff] }
 0x653   :  { %v4644_v54 = vadd.f32 %v1821_v48, %v1820_v0  ;;  %v3150_v48 = vpack.c.bf16 %v2330_v43, %v2329_v4  ;;  %v2332_v0 = vld [vmem:[%s4788_s6 + $0x78] sm:$0xff] }
 0x655   :  { %3317 = vtanh.f32 %v4644_v54 }
 0x65f   :  { %v3318_v39 = vpop.eup %3317 }
 0x660   :  { %v4647_v33 = vmul.f32 %v3318_v39, %v3316_v17 }
 0x662   :  { %1961 = vmatmul.mubr.f32.vlgmr.msra.gmra.mrb[12].mxu0 %v4647_v33  ;;  %2032 = vmatmul.mubr.f32.vlgmr.msra.gmra.mrb[28].mxu1 %v4647_v33 }
 0x663   :  { %3065 = vmatpush1.bf16.msra.mxu0 %v4510_v51  ;;  %3097 = vmatpush1.bf16.msra.mxu1 %v4300_v46  ;;  %v2135_v46 = vld [vmem:[%s4783_s4 + $0x1f0] sm:$0xff] }
 0x664   :  { %3067 = vmatprep.subr.bf16.mxu0 %v4519_v38  ;;  %3099 = vmatprep.subr.bf16.mxu1 %v4310_v56 }
 0x665   :  { %2201 = vmatprep.mubr.f32.mxu0 %v3351_v3  ;;  %2272 = vmatprep.mubr.f32.mxu1 %v3351_v3  ;;  %v2131_v3 = vld [vmem:[%s4783_s4 + $0x1d0] sm:$0xff] }
 0x666   :  { %v3124_v56 = vpack.c.bf16 %v2135_v46, %v2131_v3 }
 0x667   :  { %3069 = vmatpush1.bf16.msra.mxu0 %v4527_v8  ;;  %3101 = vmatpush1.bf16.msra.mxu1 %v4318_v63  ;;  %v2317_v63 = vld [vmem:[%s4788_s6] sm:$0xff] }
 0x668   :  { %3071 = vmatprep.subr.bf16.mxu0 %v4537_v27  ;;  %3103 = vmatprep.subr.bf16.mxu1 %v4328_v12  ;;  %v2318_v12 = vld [vmem:[%s4788_s6 + $0x8] sm:$0xff] }
 0x66b   :  { %3073 = vmatpush1.bf16.msra.mxu0 %v4545_v36  ;;  %3105 = vmatpush1.bf16.msra.mxu1 %v4336_v19  ;;  %v3126_v19 = vpack.c.bf16 %v2318_v12, %v2317_v63 }
 0x66c   :  { %3075 = vmatprep.subr.bf16.mxu0 %v4555_v7  ;;  %3107 = vmatprep.subr.bf16.mxu1 %v4346_v24 }
 0x66f   :  { %3077 = vmatpush1.bf16.msra.mxu0 %v4563_v57  ;;  %3109 = vmatpush1.bf16.msra.mxu1 %v4354_v32 }
 0x670   :  { %3079 = vmatprep.subr.bf16.mxu0 %v4573_v55  ;;  %3111 = vmatprep.subr.bf16.mxu1 %v4364_v23 }
 0x673   :  { %3081 = vmatpush1.bf16.msra.mxu0 %v4581_v58  ;;  %3113 = vmatpush1.bf16.msra.mxu1 %v4372_v34 }
 0x674   :  { %3083 = vmatprep.subr.bf16.mxu0 %v4594_v22  ;;  %3115 = vmatprep.subr.bf16.mxu1 %v4385_v40 }
 0x677   :  { %3085 = vmatpush1.bf16.msra.mxu0 %v4605_v29  ;;  %3117 = vmatpush1.bf16.msra.mxu1 %v4396_v59 }
 0x678   :  { %3087 = vmatprep.subr.bf16.mxu0 %v4607_v6  ;;  %3119 = vmatprep.subr.bf16.mxu1 %v4398_v62  ;;  %v2319_v6 = vld [vmem:[%s4788_s6 + $0x10] sm:$0xff] }
 0x67b   :  { %3089 = vmatpush1.bf16.msra.mxu0 %v4623_v16  ;;  %3121 = vmatpush1.bf16.msra.mxu1 %v4414_v47  ;;  %v2320_v16 = vld [vmem:[%s4788_s6 + $0x18] sm:$0xff] }
 0x67c   :  { %3091 = vmatprep.subr.bf16.mxu0 %v4626_v44  ;;  %3123 = vmatprep.subr.bf16.mxu1 %v4417_v50  ;;  %v3130_v20 = vpack.c.bf16 %v2320_v16, %v2319_v6 }
 0x67f   :  { %3093 = vmatpush1.bf16.msra.mxu0 %v4635_v15  ;;  %3125 = vmatpush1.bf16.msra.mxu1 %v3124_v56 }
 0x680   :  { %3127 = vmatprep.subr.bf16.mxu0 %v3126_v19 }
 0x735   :  { %v1962_v24 = vpop.f32.mrb[12].mxu0  ;;  %v2033_v32 = vpop.f32.mrb[28].mxu1 }
 0x736   :  { %v2038_v23 = vadd.f32 %v1962_v24, %v4016_v13  ;;  %v1964_v34 = vpop.f32.mrb[13].mxu0  ;;  %v2035_v40 = vpop.f32.mrb[29].mxu1  ;;  %v3202_v51 = vadd.f32 %v2033_v32, %v4024_v28 }
 0x737   :  { %v2039_v59 = vadd.f32 %v1964_v34, %v4018_v10  ;;  %v3203_v50 = vadd.f32 %v2035_v40, %v4026_v31 }
 0x738   :  { %v2475_v62 = vmul.f32 -1.442695, %v2038_v23 }
 0x739   :  { %v2476_v47 = vmul.f32 -1.442695, %v2039_v59  ;;  %v2477_v5 = vmul.f32 -1.442695, %v3203_v50 }
 0x73a   :  { %3319 = vpow2.f32 %v2475_v62 }
 0x73b   :  { %3321 = vpow2.f32 %v2476_v47 }
 0x73c   :  { %3323 = vpow2.f32 %v2477_v5 }
 0x73d   :  { %3325 = vtanh.f32 %v3202_v51 }
 0x744   :  { %v3320_v38 = vpop.eup %3319 }
 0x745   :  { %v3322_v8 = vpop.eup %3321  ;;  %v2045_v27 = vadd.f32 1.0, %v3320_v38 }
 0x746   :  { %v2051_v36 = vadd.f32 1.0, %v3322_v8  ;;  %v3324_v13 = vpop.eup %3323 }
 0x747   :  { %3327 = vrcp.f32 %v2045_v27  ;;  %v3326_v7 = vpop.eup %3325  ;;  %v2058_v58 = vadd.f32 1.0, %v3324_v13 }
 0x748   :  { %3329 = vrcp.f32 %v2051_v36 }
 0x749   :  { %3331 = vrcp.f32 %v2058_v58 }
 0x751   :  { %v3328_v10 = vpop.eup %3327 }
 0x752   :  { %v3330_v57 = vpop.eup %3329  ;;  %v2062_v55 = vmul.f32 %v3328_v10, %v3326_v7 }
 0x753   :  { %v2061_v22 = vmul.f32 %v3330_v57, %v4644_v54  ;;  %v3332_v44 = vpop.eup %3331  ;;  %v3154_v54 = vpack.c.bf16 %v2332_v0, %v2331_v52 }
 0x755   :  { %v4699_v29 = vadd.f32 %v2062_v55, %v2061_v22 }
 0x757   :  { %3333 = vtanh.f32 %v4699_v29 }
 0x761   :  { %v3334_v15 = vpop.eup %3333 }
 0x762   :  { %v2065_v37 = vmul.f32 %v3334_v15, %v3332_v44 }
 0x764   :  { %2202 = vmatmul.mubr.f32.vlgmr.msra.gmra.mrb[14].mxu0 %v2065_v37  ;;  %2273 = vmatmul.mubr.f32.vlgmr.msra.gmra.mrb[30].mxu1 %v2065_v37 }
 0x765   :  { %3129 = vmatpush3.bf16.msra.mxu0 %v3126_v19  ;;  %2538 = vmatprep.mubr.f32.mxu0 %v4036_v60  ;;  %v2326_v60 = vld [vmem:[%s4788_s6 + $0x48] sm:$0xff] }
 0x766   :  { %3131 = vmatprep.subr.bf16.mxu0 %v3130_v20  ;;  %v3142_v30 = vpack.c.bf16 %v2326_v60, %v2325_v41 }
 0x769   :  { %3133 = vmatpush3.bf16.msra.mxu0 %v3130_v20 }
 0x76a   :  { %3135 = vmatprep.subr.bf16.mxu0 %v3134_v1 }
 0x76d   :  { %3137 = vmatpush3.bf16.msra.mxu0 %v3134_v1 }
 0x76e   :  { %3139 = vmatprep.subr.bf16.mxu0 %v3138_v18 }
 0x771   :  { %3141 = vmatpush3.bf16.msra.mxu0 %v3138_v18 }
 0x772   :  { %3143 = vmatprep.subr.bf16.mxu0 %v3142_v30 }
 0x775   :  { %3145 = vmatpush3.bf16.msra.mxu0 %v3142_v30 }
 0x776   :  { %3147 = vmatprep.subr.bf16.mxu0 %v3146_v25 }
 0x779   :  { %3149 = vmatpush3.bf16.msra.mxu0 %v3146_v25 }
 0x77a   :  { %3151 = vmatprep.subr.bf16.mxu0 %v3150_v48 }
 0x77d   :  { %3153 = vmatpush3.bf16.msra.mxu0 %v3150_v48 }
 0x77e   :  { %3155 = vmatprep.subr.bf16.mxu0 %v3154_v54 }
 0x781   :  { %3157 = vmatpush3.bf16.msra.mxu0 %v3154_v54 }
 0x784   :  { %2539 = vmatmul.mubr.f32.vlgmr.msra.gmra.mrb[16].mxu0 %v4211_v35 }
 0x785   :  { %2541 = vmatprep.mubr.f32.mxu0 %v4264_v2 }
 0x788   :  { %2542 = vmatmul.mubr.f32.gmra.mrb[18].mxu0 %v4431_v21 }
 0x789   :  { %2544 = vmatprep.mubr.f32.mxu0 %v4476_v49 }
 0x78c   :  { %2545 = vmatmul.mubr.f32.gmra.mrb[20].mxu0 %v4647_v33 }
 0x78d   :  { %2547 = vmatprep.mubr.f32.mxu0 %v2065_v37 }
 0x837   :  { %v2203_v17 = vpop.f32.mrb[14].mxu0  ;;  %v2274_v39 = vpop.f32.mrb[30].mxu1 }
 0x838   :  { %v2279_v3 = vadd.f32 %v2203_v17, %v4020_v11  ;;  %v2205_v46 = vpop.f32.mrb[15].mxu0  ;;  %v2276_v56 = vpop.f32.mrb[31].mxu1  ;;  %v3204_v21 = vadd.f32 %v2274_v39, %v4024_v28  ;;  %v2481_v28 = vld [vmem:[%s4789_s7] ss:$0 sm:$0xff] }
 0x839   :  { %v2280_v63 = vadd.f32 %v2205_v46, %v4022_v14  ;;  %v3205_v35 = vadd.f32 %v2276_v56, %v4026_v31 }
 0x83a   :  { %v2478_v12 = vmul.f32 -1.442695, %v2279_v3 }
 0x83b   :  { %v2479_v19 = vmul.f32 -1.442695, %v2280_v63  ;;  %v2480_v2 = vmul.f32 -1.442695, %v3205_v35 }
 0x83c   :  { %3335 = vpow2.f32 %v2478_v12 }
 0x83d   :  { %3337 = vpow2.f32 %v2479_v19 }
 0x83e   :  { %3339 = vpow2.f32 %v2480_v2 }
 0x83f   :  { %3341 = vtanh.f32 %v3204_v21 }
 0x846   :  { %v3336_v49 = vpop.eup %3335 }
 0x847   :  { %v3338_v33 = vpop.eup %3337  ;;  %v2286_v24 = vadd.f32 1.0, %v3336_v49 }
 0x848   :  { %v2292_v32 = vadd.f32 1.0, %v3338_v33  ;;  %v3340_v11 = vpop.eup %3339 }
 0x849   :  { %3343 = vrcp.f32 %v2286_v24  ;;  %v3342_v23 = vpop.eup %3341  ;;  %v2299_v59 = vadd.f32 1.0, %v3340_v11 }
 0x84a   :  { %3345 = vrcp.f32 %v2292_v32 }
 0x84b   :  { %3347 = vrcp.f32 %v2299_v59 }
 0x853   :  { %v3344_v14 = vpop.eup %3343 }
 0x854   :  { %v3346_v34 = vpop.eup %3345  ;;  %v2303_v40 = vmul.f32 %v3344_v14, %v3342_v23 }
 0x855   :  { %v2302_v62 = vmul.f32 %v3346_v34, %v4699_v29  ;;  %v3348_v55 = vpop.eup %3347 }
 0x857   :  { %v2540_v31 = vpop.f32.mrb[16].mxu0  ;;  %v2304_v47 = vadd.f32 %v2303_v40, %v2302_v62 }
 0x858   :  { %v2412_v50 = vadd.f32 %v2540_v31, %v2481_v28  ;;  %v2406_v5 = vpop.f32.mrb[17].mxu0 }
 0x859   :  { %v2407_v51 = vadd.f32 %v2481_v28, %v2406_v5  ;;  %3349 = vtanh.f32 %v2304_v47 }
 0x85a   :  { %2446 = vst [vmem:[%s4790_s8 + $0x8] sm:$0xff] %v2412_v50 }
 0x85b   :  { %2445 = vst [vmem:[%s4790_s8] sm:$0xff] %v2407_v51  ;;  %v2543_v38 = vpop.f32.mrb[18].mxu0 }
 0x85c   :  { %v2422_v8 = vadd.f32 %v2543_v38, %v2481_v28  ;;  %v2416_v27 = vpop.f32.mrb[19].mxu0 }
 0x85d   :  { %v2417_v36 = vadd.f32 %v2481_v28, %v2416_v27 }
 0x85e   :  { %2448 = vst [vmem:[%s4790_s8 + $0x18] sm:$0xff] %v2422_v8 }
 0x85f   :  { %2447 = vst [vmem:[%s4790_s8 + $0x10] sm:$0xff] %v2417_v36  ;;  %v2546_v13 = vpop.f32.mrb[20].mxu0 }
 0x860   :  { %v2432_v7 = vadd.f32 %v2546_v13, %v2481_v28  ;;  %v2426_v10 = vpop.f32.mrb[21].mxu0 }
 0x861   :  { %v2427_v57 = vadd.f32 %v2481_v28, %v2426_v10 }
 0x862   :  { %2450 = vst [vmem:[%s4790_s8 + $0x28] sm:$0xff] %v2432_v7 }
 0x863   :  { %v3350_v58 = vpop.eup %3349  ;;  %2449 = vst [vmem:[%s4790_s8 + $0x20] sm:$0xff] %v2427_v57 }
 0x864   :  { %v2306_v22 = vmul.f32 %v3350_v58, %v3348_v55 }
 0x866   :  { %2548 = vmatmul.mubr.f32.gmra.mrb[22].mxu0 %v2306_v22 }
 0x939   :  { %v2549_v29 = vpop.f32.mrb[22].mxu0 }
 0x93a   :  { %v2442_v6 = vadd.f32 %v2549_v29, %v2481_v28  ;;  %v2436_v16 = vpop.f32.mrb[23].mxu0 }
 0x93b   :  { %v2437_v44 = vadd.f32 %v2481_v28, %v2436_v16 }
 0x93c   :  { %2452 = vst [vmem:[%s4790_s8 + $0x38] sm:$0xff] %v2442_v6 }
 0x93d   :  { %2451 = vst [vmem:[%s4790_s8 + $0x30] sm:$0xff] %v2437_v44 }

</bundles_post_ra>
